<compile_context>
chip_gen: v7x
topology: tpu7x:2x2x1
jax: 0.10.0
libtpu: 0.0.40
codegen_flags: <defaults>
</compile_context>

<pallas_src>
import math
import jax
import jax.numpy as jnp
from jax import lax
from jax.experimental import pallas as pl
from jax.experimental.pallas import tpu as pltpu


# ----------------------------------------------------------------------------
# Fused kernel: all LSTM layers + Linear/Tanh head in one invocation, no grid,
# no scratch -- everything stays in vregs.
#   inputs : x (B, S, D_in), then per layer (wih_t, whh_t, bias),
#            then (w_out_padded, b_out_padded)
#   output : (B, S, out_dim) f32, batch-major (no wrapper post-processing)
# ----------------------------------------------------------------------------
def make_fused_kernel(S, B, H, n_layers, out_dim):
    def kernel(*refs):
        x_ref = refs[0]
        layer_refs = refs[1:1 + 3 * n_layers]
        wout_ref = refs[1 + 3 * n_layers]
        bout_ref = refs[2 + 3 * n_layers]
        out_ref = refs[3 + 3 * n_layers]

        # Hoist all weight loads (loaded once, reused across the unrolled loop).
        wih = [layer_refs[3 * l + 0][...] for l in range(n_layers)]    # (D_l, 4H)
        whh = [layer_refs[3 * l + 1][...] for l in range(n_layers)]    # (H, 4H)
        bias = [layer_refs[3 * l + 2][...] for l in range(n_layers)]   # (1, 4H)
        w_out = wout_ref[...]                                          # (H, O_pad)
        b_out = bout_ref[...]                                          # (1, O_pad)

        xall = x_ref[...]                                              # (B, S, D_in)

        # xg[t]: pre-gate activations (x-projection + bias) of the layer whose
        # recurrence is currently running.  Layer 0's are computed on the fly
        # from x (independent of the serial h-chain, so the scheduler can hoist
        # / overlap them freely); layer l>0's were produced inside layer l-1's
        # loop (fused next-layer projection).
        xg = [None] * S

        for l in range(n_layers):
            last = (l == n_layers - 1)
            whh_l = whh[l]
            h = jnp.zeros((B, H), jnp.float32)
            c = jnp.zeros((B, H), jnp.float32)
            xg_next = [None] * S

            # S is small and static: fully unroll the recurrence (no grid,
            # no per-step VMEM round trips).
            for t in range(S):
                if l == 0:
                    x_t = xall[:, t:t + 1, :].reshape(B, -1)           # (B, D_in)
                    pre = (jnp.dot(x_t, wih[0],
                                   preferred_element_type=jnp.float32)
                           + bias[0])                                  # (B, 4H)
                else:
                    pre = xg[t]

                # Dot-accumulate form: pre-projected gates + h @ W_hh.
                gates = pre + jnp.dot(h, whh_l,
                                      preferred_element_type=jnp.float32)

                # One full-block sigmoid push; tanh only on the g quarter.
                sg = jax.nn.sigmoid(gates)                             # (B, 4H)
                g_g = jnp.tanh(gates[:, 2 * H:3 * H])                  # (B, H)
                i_g = sg[:, 0 * H:1 * H]
                f_g = sg[:, 1 * H:2 * H]
                o_g = sg[:, 3 * H:4 * H]

                c = f_g * c + i_g * g_g
                h = o_g * jnp.tanh(c)

                if not last:
                    # Fused next-layer input projection: hides under the serial
                    # recurrence latency (MXU has slack).
                    xg_next[t] = (jnp.dot(h, wih[l + 1],
                                          preferred_element_type=jnp.float32)
                                  + bias[l + 1])
                else:
                    # Fused Linear + Tanh head; store batch-major directly so
                    # the wrapper needs no post-transpose/slice.
                    y = jnp.tanh(jnp.dot(h, w_out,
                                         preferred_element_type=jnp.float32)
                                 + b_out)                              # (B, O_pad)
                    out_ref[:, t:t + 1, :] = y[:, :out_dim].reshape(B, 1, out_dim)

            xg = xg_next

    return kernel


# ----------------------------------------------------------------------------
# Public forward: (batch, seq, in_dim) -> (batch, seq, out_dim)
# ----------------------------------------------------------------------------
def lstm_generator_forward(x, params):
    B, S, D_in = x.shape
    n_layers = len(params["lstm"])
    H = params["lstm"][0]["whh_t"].shape[0]
    out_dim = params["linear"]["w_t"].shape[1]
    O_pad = ((out_dim + 127) // 128) * 128

    # Lane-pad head weights/bias so the head matmul is lane-dense on the MXU;
    # the padded lanes are sliced off *inside* the kernel before the store.
    w_out_p = jnp.zeros((H, O_pad), jnp.float32).at[:, :out_dim].set(
        params["linear"]["w_t"])
    b_out_p = jnp.zeros((1, O_pad), jnp.float32).at[:, :out_dim].set(
        params["linear"]["bias"])

    inputs = [x.astype(jnp.float32)]
    for lp in params["lstm"]:
        inputs += [lp["wih_t"], lp["whh_t"], lp["bias"]]
    inputs += [w_out_p, b_out_p]

    # Advisory cost estimate so XLA schedules surrounding ops sensibly.
    flops = 0
    transcendentals = 0
    d_l = D_in
    for _ in range(n_layers):
        flops += 2 * S * B * d_l * 4 * H          # input projection
        flops += 2 * S * B * H * 4 * H            # recurrent projection
        flops += 10 * S * B * H                   # cell elementwise update
        transcendentals += S * B * 6 * H          # sigmoid(4H) + tanh(H) + tanh(H)
        d_l = H
    flops += 2 * S * B * H * O_pad                # head matmul
    transcendentals += S * B * O_pad              # head tanh
    bytes_accessed = 4 * (int(x.size)
                          + sum(int(a.size) for a in inputs[1:])
                          + B * S * out_dim)

    out = pl.pallas_call(
        make_fused_kernel(S, B, H, n_layers, out_dim),
        out_shape=jax.ShapeDtypeStruct((B, S, out_dim), jnp.float32),
        in_specs=[pl.BlockSpec(memory_space=pltpu.MemorySpace.VMEM)] * len(inputs),
        out_specs=pl.BlockSpec(memory_space=pltpu.MemorySpace.VMEM),
        cost_estimate=pl.CostEstimate(flops=int(flops),
                                      transcendentals=int(transcendentals),
                                      bytes_accessed=int(bytes_accessed)),
    )(*inputs)
    return out


# ----------------------------------------------------------------------------
# Parameter construction (matches the module's init_weights: kaiming-uniform
# 'relu' weights, zero biases) with weights stored pre-transposed for the MXU.
# ----------------------------------------------------------------------------
def kaiming_uniform(key, shape):
    # PyTorch kaiming_uniform_(nonlinearity='relu'): gain=sqrt(2), fan_in=shape[1]
    fan_in = shape[1]
    bound = math.sqrt(2.0) * math.sqrt(3.0 / fan_in)
    return jax.random.uniform(key, shape, jnp.float32, -bound, bound)


def init_params(key, in_dim, out_dim, n_layers, hidden_dim):
    params = {"lstm": [], "linear": {}}
    for layer in range(n_layers):
        layer_in = in_dim if layer == 0 else hidden_dim
        key, k1, k2 = jax.random.split(key, 3)
        w_ih = kaiming_uniform(k1, (4 * hidden_dim, layer_in))   # PyTorch shape
        w_hh = kaiming_uniform(k2, (4 * hidden_dim, hidden_dim))
        b_ih = jnp.zeros((4 * hidden_dim,), jnp.float32)
        b_hh = jnp.zeros((4 * hidden_dim,), jnp.float32)
        params["lstm"].append({
            "wih_t": w_ih.T,                                     # (layer_in, 4H)
            "whh_t": w_hh.T,                                     # (H, 4H)
            "bias": (b_ih + b_hh).reshape(1, 4 * hidden_dim),    # (1, 4H)
        })
    key, k3 = jax.random.split(key)
    w_lin = kaiming_uniform(k3, (out_dim, hidden_dim))           # PyTorch shape
    params["linear"] = {
        "w_t": w_lin.T,                                          # (H, out_dim)
        "bias": jnp.zeros((1, out_dim), jnp.float32),
    }
    return params


# ----------------------------------------------------------------------------
# Pure-JAX reference (lax.scan LSTM) for a correctness sanity check.
# ----------------------------------------------------------------------------
def reference_forward(x, params):
    B, S, _ = x.shape
    h_seq = jnp.transpose(x, (1, 0, 2)).astype(jnp.float32)
    for lp in params["lstm"]:
        H = lp["whh_t"].shape[0]

        def step(carry, x_t):
            h, c = carry
            gates = x_t @ lp["wih_t"] + h @ lp["whh_t"] + lp["bias"]
            i = jax.nn.sigmoid(gates[:, 0 * H:1 * H])
            f = jax.nn.sigmoid(gates[:, 1 * H:2 * H])
            g = jnp.tanh(gates[:, 2 * H:3 * H])
            o = jax.nn.sigmoid(gates[:, 3 * H:4 * H])
            c = f * c + i * g
            h = o * jnp.tanh(c)
            return (h, c), h

        init = (jnp.zeros((B, H), jnp.float32), jnp.zeros((B, H), jnp.float32))
        _, h_seq = lax.scan(step, init, h_seq)
    h_flat = jnp.transpose(h_seq, (1, 0, 2)).reshape(B * S, -1)
    y = jnp.tanh(h_flat @ params["linear"]["w_t"] + params["linear"]["bias"])
    return y.reshape(B, S, -1)


if __name__ == "__main__":
    batch, seq_len = 8, 8
    in_dim, hidden_dim, out_dim, n_layers = 16, 32, 8, 2   # exercises layer fusion

    key = jax.random.PRNGKey(0)
    key, pkey, xkey = jax.random.split(key, 3)
    params = init_params(pkey, in_dim, out_dim, n_layers, hidden_dim)
    noise = jax.random.normal(xkey, (batch, seq_len, in_dim), jnp.float32)

    out = jax.block_until_ready(lstm_generator_forward(noise, params))

    ref = jax.block_until_ready(reference_forward(noise, params))
    assert out.shape == (batch, seq_len, out_dim)
    assert jnp.max(jnp.abs(out - ref)) < 1e-4, "Pallas output mismatch vs reference"

    print("KERNEL_OK")
</pallas_src>

<mosaic_0001>
module attributes {stable_mosaic.version = 11 : i64} {
  func.func @kernel(%arg0: memref<8x8x16xf32, #tpu.memory_space<vmem>>, %arg1: memref<16x128xf32, #tpu.memory_space<vmem>>, %arg2: memref<32x128xf32, #tpu.memory_space<vmem>>, %arg3: memref<1x128xf32, #tpu.memory_space<vmem>>, %arg4: memref<32x128xf32, #tpu.memory_space<vmem>>, %arg5: memref<32x128xf32, #tpu.memory_space<vmem>>, %arg6: memref<1x128xf32, #tpu.memory_space<vmem>>, %arg7: memref<32x128xf32, #tpu.memory_space<vmem>>, %arg8: memref<1x128xf32, #tpu.memory_space<vmem>>, %arg9: memref<8x8x8xf32, #tpu.memory_space<vmem>>) attributes {dimension_semantics = [], scalar_prefetch = 0 : i64, scratch_operands = 0 : i64, tpu.core_type = #tpu.core_type<tc>} {
    %c0 = arith.constant 0 : index
    %c0_0 = arith.constant 0 : index
    %0 = vector.load %arg1[%c0, %c0_0] : memref<16x128xf32, #tpu.memory_space<vmem>>, vector<16x128xf32>
    %c0_1 = arith.constant 0 : index
    %c0_2 = arith.constant 0 : index
    %1 = vector.load %arg4[%c0_1, %c0_2] : memref<32x128xf32, #tpu.memory_space<vmem>>, vector<32x128xf32>
    %c0_3 = arith.constant 0 : index
    %c0_4 = arith.constant 0 : index
    %2 = vector.load %arg2[%c0_3, %c0_4] : memref<32x128xf32, #tpu.memory_space<vmem>>, vector<32x128xf32>
    %c0_5 = arith.constant 0 : index
    %c0_6 = arith.constant 0 : index
    %3 = vector.load %arg5[%c0_5, %c0_6] : memref<32x128xf32, #tpu.memory_space<vmem>>, vector<32x128xf32>
    %c0_7 = arith.constant 0 : index
    %c0_8 = arith.constant 0 : index
    %4 = vector.load %arg3[%c0_7, %c0_8] : memref<1x128xf32, #tpu.memory_space<vmem>>, vector<1x128xf32>
    %c0_9 = arith.constant 0 : index
    %c0_10 = arith.constant 0 : index
    %5 = vector.load %arg6[%c0_9, %c0_10] : memref<1x128xf32, #tpu.memory_space<vmem>>, vector<1x128xf32>
    %c0_11 = arith.constant 0 : index
    %c0_12 = arith.constant 0 : index
    %6 = vector.load %arg7[%c0_11, %c0_12] : memref<32x128xf32, #tpu.memory_space<vmem>>, vector<32x128xf32>
    %c0_13 = arith.constant 0 : index
    %c0_14 = arith.constant 0 : index
    %7 = vector.load %arg8[%c0_13, %c0_14] : memref<1x128xf32, #tpu.memory_space<vmem>>, vector<1x128xf32>
    %c0_15 = arith.constant 0 : index
    %c0_16 = arith.constant 0 : index
    %c0_17 = arith.constant 0 : index
    %8 = vector.load %arg0[%c0_15, %c0_16, %c0_17] : memref<8x8x16xf32, #tpu.memory_space<vmem>>, vector<8x8x16xf32>
    %cst = arith.constant 0.000000e+00 : f32
    %9 = vector.broadcast %cst : f32 to vector<8x32xf32>
    %cst_18 = arith.constant 0.000000e+00 : f32
    %10 = vector.broadcast %cst_18 : f32 to vector<8x32xf32>
    %11 = vector.extract_strided_slice %8 {offsets = [0, 0, 0], sizes = [8, 1, 16], strides = [1, 1, 1]} : vector<8x8x16xf32> to vector<8x1x16xf32>
    %12 = vector.shape_cast %11 : vector<8x1x16xf32> to vector<8x16xf32>
    %cst_19 = arith.constant dense<0.000000e+00> : vector<8x128xf32>
    %13 = tpu.matmul %12, %0, %cst_19 {dimension_numbers = #tpu.dot_dimension_numbers<[1], [0], [0], [1], [0, 0, 1, 1], [], []>} : vector<8x16xf32>, vector<16x128xf32>, vector<8x128xf32> -> vector<8x128xf32>
    %14 = vector.broadcast %4 : vector<1x128xf32> to vector<8x128xf32>
    %15 = arith.addf %13, %14 : vector<8x128xf32>
    %cst_20 = arith.constant dense<0.000000e+00> : vector<8x128xf32>
    %16 = tpu.matmul %9, %2, %cst_20 {dimension_numbers = #tpu.dot_dimension_numbers<[1], [0], [0], [1], [0, 0, 1, 1], [], []>} : vector<8x32xf32>, vector<32x128xf32>, vector<8x128xf32> -> vector<8x128xf32>
    %17 = arith.addf %15, %16 : vector<8x128xf32>
    %18 = arith.negf %17 : vector<8x128xf32>
    %19 = math.exp %18 : vector<8x128xf32>
    %cst_21 = arith.constant 1.000000e+00 : f32
    %20 = vector.broadcast %cst_21 : f32 to vector<8x128xf32>
    %21 = arith.addf %20, %19 : vector<8x128xf32>
    %22 = arith.divf %20, %21 : vector<8x128xf32>
    %23 = vector.extract_strided_slice %17 {offsets = [0, 64], sizes = [8, 32], strides = [1, 1]} : vector<8x128xf32> to vector<8x32xf32>
    %24 = math.tanh %23 : vector<8x32xf32>
    %25 = vector.extract_strided_slice %22 {offsets = [0, 0], sizes = [8, 32], strides = [1, 1]} : vector<8x128xf32> to vector<8x32xf32>
    %26 = vector.extract_strided_slice %22 {offsets = [0, 32], sizes = [8, 32], strides = [1, 1]} : vector<8x128xf32> to vector<8x32xf32>
    %27 = vector.extract_strided_slice %22 {offsets = [0, 96], sizes = [8, 32], strides = [1, 1]} : vector<8x128xf32> to vector<8x32xf32>
    %28 = arith.mulf %26, %10 : vector<8x32xf32>
    %29 = arith.mulf %25, %24 : vector<8x32xf32>
    %30 = arith.addf %28, %29 : vector<8x32xf32>
    %31 = math.tanh %30 : vector<8x32xf32>
    %32 = arith.mulf %27, %31 : vector<8x32xf32>
    %cst_22 = arith.constant dense<0.000000e+00> : vector<8x128xf32>
    %33 = tpu.matmul %32, %1, %cst_22 {dimension_numbers = #tpu.dot_dimension_numbers<[1], [0], [0], [1], [0, 0, 1, 1], [], []>} : vector<8x32xf32>, vector<32x128xf32>, vector<8x128xf32> -> vector<8x128xf32>
    %34 = vector.broadcast %5 : vector<1x128xf32> to vector<8x128xf32>
    %35 = arith.addf %33, %34 : vector<8x128xf32>
    %36 = vector.extract_strided_slice %8 {offsets = [0, 1, 0], sizes = [8, 1, 16], strides = [1, 1, 1]} : vector<8x8x16xf32> to vector<8x1x16xf32>
    %37 = vector.shape_cast %36 : vector<8x1x16xf32> to vector<8x16xf32>
    %cst_23 = arith.constant dense<0.000000e+00> : vector<8x128xf32>
    %38 = tpu.matmul %37, %0, %cst_23 {dimension_numbers = #tpu.dot_dimension_numbers<[1], [0], [0], [1], [0, 0, 1, 1], [], []>} : vector<8x16xf32>, vector<16x128xf32>, vector<8x128xf32> -> vector<8x128xf32>
    %39 = vector.broadcast %4 : vector<1x128xf32> to vector<8x128xf32>
    %40 = arith.addf %38, %39 : vector<8x128xf32>
    %cst_24 = arith.constant dense<0.000000e+00> : vector<8x128xf32>
    %41 = tpu.matmul %32, %2, %cst_24 {dimension_numbers = #tpu.dot_dimension_numbers<[1], [0], [0], [1], [0, 0, 1, 1], [], []>} : vector<8x32xf32>, vector<32x128xf32>, vector<8x128xf32> -> vector<8x128xf32>
    %42 = arith.addf %40, %41 : vector<8x128xf32>
    %43 = arith.negf %42 : vector<8x128xf32>
    %44 = math.exp %43 : vector<8x128xf32>
    %cst_25 = arith.constant 1.000000e+00 : f32
    %45 = vector.broadcast %cst_25 : f32 to vector<8x128xf32>
    %46 = arith.addf %45, %44 : vector<8x128xf32>
    %47 = arith.divf %45, %46 : vector<8x128xf32>
    %48 = vector.extract_strided_slice %42 {offsets = [0, 64], sizes = [8, 32], strides = [1, 1]} : vector<8x128xf32> to vector<8x32xf32>
    %49 = math.tanh %48 : vector<8x32xf32>
    %50 = vector.extract_strided_slice %47 {offsets = [0, 0], sizes = [8, 32], strides = [1, 1]} : vector<8x128xf32> to vector<8x32xf32>
    %51 = vector.extract_strided_slice %47 {offsets = [0, 32], sizes = [8, 32], strides = [1, 1]} : vector<8x128xf32> to vector<8x32xf32>
    %52 = vector.extract_strided_slice %47 {offsets = [0, 96], sizes = [8, 32], strides = [1, 1]} : vector<8x128xf32> to vector<8x32xf32>
    %53 = arith.mulf %51, %30 : vector<8x32xf32>
    %54 = arith.mulf %50, %49 : vector<8x32xf32>
    %55 = arith.addf %53, %54 : vector<8x32xf32>
    %56 = math.tanh %55 : vector<8x32xf32>
    %57 = arith.mulf %52, %56 : vector<8x32xf32>
    %cst_26 = arith.constant dense<0.000000e+00> : vector<8x128xf32>
    %58 = tpu.matmul %57, %1, %cst_26 {dimension_numbers = #tpu.dot_dimension_numbers<[1], [0], [0], [1], [0, 0, 1, 1], [], []>} : vector<8x32xf32>, vector<32x128xf32>, vector<8x128xf32> -> vector<8x128xf32>
    %59 = vector.broadcast %5 : vector<1x128xf32> to vector<8x128xf32>
    %60 = arith.addf %58, %59 : vector<8x128xf32>
    %61 = vector.extract_strided_slice %8 {offsets = [0, 2, 0], sizes = [8, 1, 16], strides = [1, 1, 1]} : vector<8x8x16xf32> to vector<8x1x16xf32>
    %62 = vector.shape_cast %61 : vector<8x1x16xf32> to vector<8x16xf32>
    %cst_27 = arith.constant dense<0.000000e+00> : vector<8x128xf32>
    %63 = tpu.matmul %62, %0, %cst_27 {dimension_numbers = #tpu.dot_dimension_numbers<[1], [0], [0], [1], [0, 0, 1, 1], [], []>} : vector<8x16xf32>, vector<16x128xf32>, vector<8x128xf32> -> vector<8x128xf32>
    %64 = vector.broadcast %4 : vector<1x128xf32> to vector<8x128xf32>
    %65 = arith.addf %63, %64 : vector<8x128xf32>
    %cst_28 = arith.constant dense<0.000000e+00> : vector<8x128xf32>
    %66 = tpu.matmul %57, %2, %cst_28 {dimension_numbers = #tpu.dot_dimension_numbers<[1], [0], [0], [1], [0, 0, 1, 1], [], []>} : vector<8x32xf32>, vector<32x128xf32>, vector<8x128xf32> -> vector<8x128xf32>
    %67 = arith.addf %65, %66 : vector<8x128xf32>
    %68 = arith.negf %67 : vector<8x128xf32>
    %69 = math.exp %68 : vector<8x128xf32>
    %cst_29 = arith.constant 1.000000e+00 : f32
    %70 = vector.broadcast %cst_29 : f32 to vector<8x128xf32>
    %71 = arith.addf %70, %69 : vector<8x128xf32>
    %72 = arith.divf %70, %71 : vector<8x128xf32>
    %73 = vector.extract_strided_slice %67 {offsets = [0, 64], sizes = [8, 32], strides = [1, 1]} : vector<8x128xf32> to vector<8x32xf32>
    %74 = math.tanh %73 : vector<8x32xf32>
    %75 = vector.extract_strided_slice %72 {offsets = [0, 0], sizes = [8, 32], strides = [1, 1]} : vector<8x128xf32> to vector<8x32xf32>
    %76 = vector.extract_strided_slice %72 {offsets = [0, 32], sizes = [8, 32], strides = [1, 1]} : vector<8x128xf32> to vector<8x32xf32>
    %77 = vector.extract_strided_slice %72 {offsets = [0, 96], sizes = [8, 32], strides = [1, 1]} : vector<8x128xf32> to vector<8x32xf32>
    %78 = arith.mulf %76, %55 : vector<8x32xf32>
    %79 = arith.mulf %75, %74 : vector<8x32xf32>
    %80 = arith.addf %78, %79 : vector<8x32xf32>
    %81 = math.tanh %80 : vector<8x32xf32>
    %82 = arith.mulf %77, %81 : vector<8x32xf32>
    %cst_30 = arith.constant dense<0.000000e+00> : vector<8x128xf32>
    %83 = tpu.matmul %82, %1, %cst_30 {dimension_numbers = #tpu.dot_dimension_numbers<[1], [0], [0], [1], [0, 0, 1, 1], [], []>} : vector<8x32xf32>, vector<32x128xf32>, vector<8x128xf32> -> vector<8x128xf32>
    %84 = vector.broadcast %5 : vector<1x128xf32> to vector<8x128xf32>
    %85 = arith.addf %83, %84 : vector<8x128xf32>
    %86 = vector.extract_strided_slice %8 {offsets = [0, 3, 0], sizes = [8, 1, 16], strides = [1, 1, 1]} : vector<8x8x16xf32> to vector<8x1x16xf32>
    %87 = vector.shape_cast %86 : vector<8x1x16xf32> to vector<8x16xf32>
    %cst_31 = arith.constant dense<0.000000e+00> : vector<8x128xf32>
    %88 = tpu.matmul %87, %0, %cst_31 {dimension_numbers = #tpu.dot_dimension_numbers<[1], [0], [0], [1], [0, 0, 1, 1], [], []>} : vector<8x16xf32>, vector<16x128xf32>, vector<8x128xf32> -> vector<8x128xf32>
    %89 = vector.broadcast %4 : vector<1x128xf32> to vector<8x128xf32>
    %90 = arith.addf %88, %89 : vector<8x128xf32>
    %cst_32 = arith.constant dense<0.000000e+00> : vector<8x128xf32>
    %91 = tpu.matmul %82, %2, %cst_32 {dimension_numbers = #tpu.dot_dimension_numbers<[1], [0], [0], [1], [0, 0, 1, 1], [], []>} : vector<8x32xf32>, vector<32x128xf32>, vector<8x128xf32> -> vector<8x128xf32>
    %92 = arith.addf %90, %91 : vector<8x128xf32>
    %93 = arith.negf %92 : vector<8x128xf32>
    %94 = math.exp %93 : vector<8x128xf32>
    %cst_33 = arith.constant 1.000000e+00 : f32
    %95 = vector.broadcast %cst_33 : f32 to vector<8x128xf32>
    %96 = arith.addf %95, %94 : vector<8x128xf32>
    %97 = arith.divf %95, %96 : vector<8x128xf32>
    %98 = vector.extract_strided_slice %92 {offsets = [0, 64], sizes = [8, 32], strides = [1, 1]} : vector<8x128xf32> to vector<8x32xf32>
    %99 = math.tanh %98 : vector<8x32xf32>
    %100 = vector.extract_strided_slice %97 {offsets = [0, 0], sizes = [8, 32], strides = [1, 1]} : vector<8x128xf32> to vector<8x32xf32>
    %101 = vector.extract_strided_slice %97 {offsets = [0, 32], sizes = [8, 32], strides = [1, 1]} : vector<8x128xf32> to vector<8x32xf32>
    %102 = vector.extract_strided_slice %97 {offsets = [0, 96], sizes = [8, 32], strides = [1, 1]} : vector<8x128xf32> to vector<8x32xf32>
    %103 = arith.mulf %101, %80 : vector<8x32xf32>
    %104 = arith.mulf %100, %99 : vector<8x32xf32>
    %105 = arith.addf %103, %104 : vector<8x32xf32>
    %106 = math.tanh %105 : vector<8x32xf32>
    %107 = arith.mulf %102, %106 : vector<8x32xf32>
    %cst_34 = arith.constant dense<0.000000e+00> : vector<8x128xf32>
    %108 = tpu.matmul %107, %1, %cst_34 {dimension_numbers = #tpu.dot_dimension_numbers<[1], [0], [0], [1], [0, 0, 1, 1], [], []>} : vector<8x32xf32>, vector<32x128xf32>, vector<8x128xf32> -> vector<8x128xf32>
    %109 = vector.broadcast %5 : vector<1x128xf32> to vector<8x128xf32>
    %110 = arith.addf %108, %109 : vector<8x128xf32>
    %111 = vector.extract_strided_slice %8 {offsets = [0, 4, 0], sizes = [8, 1, 16], strides = [1, 1, 1]} : vector<8x8x16xf32> to vector<8x1x16xf32>
    %112 = vector.shape_cast %111 : vector<8x1x16xf32> to vector<8x16xf32>
    %cst_35 = arith.constant dense<0.000000e+00> : vector<8x128xf32>
    %113 = tpu.matmul %112, %0, %cst_35 {dimension_numbers = #tpu.dot_dimension_numbers<[1], [0], [0], [1], [0, 0, 1, 1], [], []>} : vector<8x16xf32>, vector<16x128xf32>, vector<8x128xf32> -> vector<8x128xf32>
    %114 = vector.broadcast %4 : vector<1x128xf32> to vector<8x128xf32>
    %115 = arith.addf %113, %114 : vector<8x128xf32>
    %cst_36 = arith.constant dense<0.000000e+00> : vector<8x128xf32>
    %116 = tpu.matmul %107, %2, %cst_36 {dimension_numbers = #tpu.dot_dimension_numbers<[1], [0], [0], [1], [0, 0, 1, 1], [], []>} : vector<8x32xf32>, vector<32x128xf32>, vector<8x128xf32> -> vector<8x128xf32>
    %117 = arith.addf %115, %116 : vector<8x128xf32>
    %118 = arith.negf %117 : vector<8x128xf32>
    %119 = math.exp %118 : vector<8x128xf32>
    %cst_37 = arith.constant 1.000000e+00 : f32
    %120 = vector.broadcast %cst_37 : f32 to vector<8x128xf32>
    %121 = arith.addf %120, %119 : vector<8x128xf32>
    %122 = arith.divf %120, %121 : vector<8x128xf32>
    %123 = vector.extract_strided_slice %117 {offsets = [0, 64], sizes = [8, 32], strides = [1, 1]} : vector<8x128xf32> to vector<8x32xf32>
    %124 = math.tanh %123 : vector<8x32xf32>
    %125 = vector.extract_strided_slice %122 {offsets = [0, 0], sizes = [8, 32], strides = [1, 1]} : vector<8x128xf32> to vector<8x32xf32>
    %126 = vector.extract_strided_slice %122 {offsets = [0, 32], sizes = [8, 32], strides = [1, 1]} : vector<8x128xf32> to vector<8x32xf32>
    %127 = vector.extract_strided_slice %122 {offsets = [0, 96], sizes = [8, 32], strides = [1, 1]} : vector<8x128xf32> to vector<8x32xf32>
    %128 = arith.mulf %126, %105 : vector<8x32xf32>
    %129 = arith.mulf %125, %124 : vector<8x32xf32>
    %130 = arith.addf %128, %129 : vector<8x32xf32>
    %131 = math.tanh %130 : vector<8x32xf32>
    %132 = arith.mulf %127, %131 : vector<8x32xf32>
    %cst_38 = arith.constant dense<0.000000e+00> : vector<8x128xf32>
    %133 = tpu.matmul %132, %1, %cst_38 {dimension_numbers = #tpu.dot_dimension_numbers<[1], [0], [0], [1], [0, 0, 1, 1], [], []>} : vector<8x32xf32>, vector<32x128xf32>, vector<8x128xf32> -> vector<8x128xf32>
    %134 = vector.broadcast %5 : vector<1x128xf32> to vector<8x128xf32>
    %135 = arith.addf %133, %134 : vector<8x128xf32>
    %136 = vector.extract_strided_slice %8 {offsets = [0, 5, 0], sizes = [8, 1, 16], strides = [1, 1, 1]} : vector<8x8x16xf32> to vector<8x1x16xf32>
    %137 = vector.shape_cast %136 : vector<8x1x16xf32> to vector<8x16xf32>
    %cst_39 = arith.constant dense<0.000000e+00> : vector<8x128xf32>
    %138 = tpu.matmul %137, %0, %cst_39 {dimension_numbers = #tpu.dot_dimension_numbers<[1], [0], [0], [1], [0, 0, 1, 1], [], []>} : vector<8x16xf32>, vector<16x128xf32>, vector<8x128xf32> -> vector<8x128xf32>
    %139 = vector.broadcast %4 : vector<1x128xf32> to vector<8x128xf32>
    %140 = arith.addf %138, %139 : vector<8x128xf32>
    %cst_40 = arith.constant dense<0.000000e+00> : vector<8x128xf32>
    %141 = tpu.matmul %132, %2, %cst_40 {dimension_numbers = #tpu.dot_dimension_numbers<[1], [0], [0], [1], [0, 0, 1, 1], [], []>} : vector<8x32xf32>, vector<32x128xf32>, vector<8x128xf32> -> vector<8x128xf32>
    %142 = arith.addf %140, %141 : vector<8x128xf32>
    %143 = arith.negf %142 : vector<8x128xf32>
    %144 = math.exp %143 : vector<8x128xf32>
    %cst_41 = arith.constant 1.000000e+00 : f32
    %145 = vector.broadcast %cst_41 : f32 to vector<8x128xf32>
    %146 = arith.addf %145, %144 : vector<8x128xf32>
    %147 = arith.divf %145, %146 : vector<8x128xf32>
    %148 = vector.extract_strided_slice %142 {offsets = [0, 64], sizes = [8, 32], strides = [1, 1]} : vector<8x128xf32> to vector<8x32xf32>
    %149 = math.tanh %148 : vector<8x32xf32>
    %150 = vector.extract_strided_slice %147 {offsets = [0, 0], sizes = [8, 32], strides = [1, 1]} : vector<8x128xf32> to vector<8x32xf32>
    %151 = vector.extract_strided_slice %147 {offsets = [0, 32], sizes = [8, 32], strides = [1, 1]} : vector<8x128xf32> to vector<8x32xf32>
    %152 = vector.extract_strided_slice %147 {offsets = [0, 96], sizes = [8, 32], strides = [1, 1]} : vector<8x128xf32> to vector<8x32xf32>
    %153 = arith.mulf %151, %130 : vector<8x32xf32>
    %154 = arith.mulf %150, %149 : vector<8x32xf32>
    %155 = arith.addf %153, %154 : vector<8x32xf32>
    %156 = math.tanh %155 : vector<8x32xf32>
    %157 = arith.mulf %152, %156 : vector<8x32xf32>
    %cst_42 = arith.constant dense<0.000000e+00> : vector<8x128xf32>
    %158 = tpu.matmul %157, %1, %cst_42 {dimension_numbers = #tpu.dot_dimension_numbers<[1], [0], [0], [1], [0, 0, 1, 1], [], []>} : vector<8x32xf32>, vector<32x128xf32>, vector<8x128xf32> -> vector<8x128xf32>
    %159 = vector.broadcast %5 : vector<1x128xf32> to vector<8x128xf32>
    %160 = arith.addf %158, %159 : vector<8x128xf32>
    %161 = vector.extract_strided_slice %8 {offsets = [0, 6, 0], sizes = [8, 1, 16], strides = [1, 1, 1]} : vector<8x8x16xf32> to vector<8x1x16xf32>
    %162 = vector.shape_cast %161 : vector<8x1x16xf32> to vector<8x16xf32>
    %cst_43 = arith.constant dense<0.000000e+00> : vector<8x128xf32>
    %163 = tpu.matmul %162, %0, %cst_43 {dimension_numbers = #tpu.dot_dimension_numbers<[1], [0], [0], [1], [0, 0, 1, 1], [], []>} : vector<8x16xf32>, vector<16x128xf32>, vector<8x128xf32> -> vector<8x128xf32>
    %164 = vector.broadcast %4 : vector<1x128xf32> to vector<8x128xf32>
    %165 = arith.addf %163, %164 : vector<8x128xf32>
    %cst_44 = arith.constant dense<0.000000e+00> : vector<8x128xf32>
    %166 = tpu.matmul %157, %2, %cst_44 {dimension_numbers = #tpu.dot_dimension_numbers<[1], [0], [0], [1], [0, 0, 1, 1], [], []>} : vector<8x32xf32>, vector<32x128xf32>, vector<8x128xf32> -> vector<8x128xf32>
    %167 = arith.addf %165, %166 : vector<8x128xf32>
    %168 = arith.negf %167 : vector<8x128xf32>
    %169 = math.exp %168 : vector<8x128xf32>
    %cst_45 = arith.constant 1.000000e+00 : f32
    %170 = vector.broadcast %cst_45 : f32 to vector<8x128xf32>
    %171 = arith.addf %170, %169 : vector<8x128xf32>
    %172 = arith.divf %170, %171 : vector<8x128xf32>
    %173 = vector.extract_strided_slice %167 {offsets = [0, 64], sizes = [8, 32], strides = [1, 1]} : vector<8x128xf32> to vector<8x32xf32>
    %174 = math.tanh %173 : vector<8x32xf32>
    %175 = vector.extract_strided_slice %172 {offsets = [0, 0], sizes = [8, 32], strides = [1, 1]} : vector<8x128xf32> to vector<8x32xf32>
    %176 = vector.extract_strided_slice %172 {offsets = [0, 32], sizes = [8, 32], strides = [1, 1]} : vector<8x128xf32> to vector<8x32xf32>
    %177 = vector.extract_strided_slice %172 {offsets = [0, 96], sizes = [8, 32], strides = [1, 1]} : vector<8x128xf32> to vector<8x32xf32>
    %178 = arith.mulf %176, %155 : vector<8x32xf32>
    %179 = arith.mulf %175, %174 : vector<8x32xf32>
    %180 = arith.addf %178, %179 : vector<8x32xf32>
    %181 = math.tanh %180 : vector<8x32xf32>
    %182 = arith.mulf %177, %181 : vector<8x32xf32>
    %cst_46 = arith.constant dense<0.000000e+00> : vector<8x128xf32>
    %183 = tpu.matmul %182, %1, %cst_46 {dimension_numbers = #tpu.dot_dimension_numbers<[1], [0], [0], [1], [0, 0, 1, 1], [], []>} : vector<8x32xf32>, vector<32x128xf32>, vector<8x128xf32> -> vector<8x128xf32>
    %184 = vector.broadcast %5 : vector<1x128xf32> to vector<8x128xf32>
    %185 = arith.addf %183, %184 : vector<8x128xf32>
    %186 = vector.extract_strided_slice %8 {offsets = [0, 7, 0], sizes = [8, 1, 16], strides = [1, 1, 1]} : vector<8x8x16xf32> to vector<8x1x16xf32>
    %187 = vector.shape_cast %186 : vector<8x1x16xf32> to vector<8x16xf32>
    %cst_47 = arith.constant dense<0.000000e+00> : vector<8x128xf32>
    %188 = tpu.matmul %187, %0, %cst_47 {dimension_numbers = #tpu.dot_dimension_numbers<[1], [0], [0], [1], [0, 0, 1, 1], [], []>} : vector<8x16xf32>, vector<16x128xf32>, vector<8x128xf32> -> vector<8x128xf32>
    %189 = vector.broadcast %4 : vector<1x128xf32> to vector<8x128xf32>
    %190 = arith.addf %188, %189 : vector<8x128xf32>
    %cst_48 = arith.constant dense<0.000000e+00> : vector<8x128xf32>
    %191 = tpu.matmul %182, %2, %cst_48 {dimension_numbers = #tpu.dot_dimension_numbers<[1], [0], [0], [1], [0, 0, 1, 1], [], []>} : vector<8x32xf32>, vector<32x128xf32>, vector<8x128xf32> -> vector<8x128xf32>
    %192 = arith.addf %190, %191 : vector<8x128xf32>
    %193 = arith.negf %192 : vector<8x128xf32>
    %194 = math.exp %193 : vector<8x128xf32>
    %cst_49 = arith.constant 1.000000e+00 : f32
    %195 = vector.broadcast %cst_49 : f32 to vector<8x128xf32>
    %196 = arith.addf %195, %194 : vector<8x128xf32>
    %197 = arith.divf %195, %196 : vector<8x128xf32>
    %198 = vector.extract_strided_slice %192 {offsets = [0, 64], sizes = [8, 32], strides = [1, 1]} : vector<8x128xf32> to vector<8x32xf32>
    %199 = math.tanh %198 : vector<8x32xf32>
    %200 = vector.extract_strided_slice %197 {offsets = [0, 0], sizes = [8, 32], strides = [1, 1]} : vector<8x128xf32> to vector<8x32xf32>
    %201 = vector.extract_strided_slice %197 {offsets = [0, 32], sizes = [8, 32], strides = [1, 1]} : vector<8x128xf32> to vector<8x32xf32>
    %202 = vector.extract_strided_slice %197 {offsets = [0, 96], sizes = [8, 32], strides = [1, 1]} : vector<8x128xf32> to vector<8x32xf32>
    %203 = arith.mulf %201, %180 : vector<8x32xf32>
    %204 = arith.mulf %200, %199 : vector<8x32xf32>
    %205 = arith.addf %203, %204 : vector<8x32xf32>
    %206 = math.tanh %205 : vector<8x32xf32>
    %207 = arith.mulf %202, %206 : vector<8x32xf32>
    %cst_50 = arith.constant dense<0.000000e+00> : vector<8x128xf32>
    %208 = tpu.matmul %207, %1, %cst_50 {dimension_numbers = #tpu.dot_dimension_numbers<[1], [0], [0], [1], [0, 0, 1, 1], [], []>} : vector<8x32xf32>, vector<32x128xf32>, vector<8x128xf32> -> vector<8x128xf32>
    %209 = vector.broadcast %5 : vector<1x128xf32> to vector<8x128xf32>
    %210 = arith.addf %208, %209 : vector<8x128xf32>
    %cst_51 = arith.constant 0.000000e+00 : f32
    %211 = vector.broadcast %cst_51 : f32 to vector<8x32xf32>
    %cst_52 = arith.constant 0.000000e+00 : f32
    %212 = vector.broadcast %cst_52 : f32 to vector<8x32xf32>
    %cst_53 = arith.constant dense<0.000000e+00> : vector<8x128xf32>
    %213 = tpu.matmul %211, %3, %cst_53 {dimension_numbers = #tpu.dot_dimension_numbers<[1], [0], [0], [1], [0, 0, 1, 1], [], []>} : vector<8x32xf32>, vector<32x128xf32>, vector<8x128xf32> -> vector<8x128xf32>
    %214 = arith.addf %35, %213 : vector<8x128xf32>
    %215 = arith.negf %214 : vector<8x128xf32>
    %216 = math.exp %215 : vector<8x128xf32>
    %cst_54 = arith.constant 1.000000e+00 : f32
    %217 = vector.broadcast %cst_54 : f32 to vector<8x128xf32>
    %218 = arith.addf %217, %216 : vector<8x128xf32>
    %219 = arith.divf %217, %218 : vector<8x128xf32>
    %220 = vector.extract_strided_slice %214 {offsets = [0, 64], sizes = [8, 32], strides = [1, 1]} : vector<8x128xf32> to vector<8x32xf32>
    %221 = math.tanh %220 : vector<8x32xf32>
    %222 = vector.extract_strided_slice %219 {offsets = [0, 0], sizes = [8, 32], strides = [1, 1]} : vector<8x128xf32> to vector<8x32xf32>
    %223 = vector.extract_strided_slice %219 {offsets = [0, 32], sizes = [8, 32], strides = [1, 1]} : vector<8x128xf32> to vector<8x32xf32>
    %224 = vector.extract_strided_slice %219 {offsets = [0, 96], sizes = [8, 32], strides = [1, 1]} : vector<8x128xf32> to vector<8x32xf32>
    %225 = arith.mulf %223, %212 : vector<8x32xf32>
    %226 = arith.mulf %222, %221 : vector<8x32xf32>
    %227 = arith.addf %225, %226 : vector<8x32xf32>
    %228 = math.tanh %227 : vector<8x32xf32>
    %229 = arith.mulf %224, %228 : vector<8x32xf32>
    %cst_55 = arith.constant dense<0.000000e+00> : vector<8x128xf32>
    %230 = tpu.matmul %229, %6, %cst_55 {dimension_numbers = #tpu.dot_dimension_numbers<[1], [0], [0], [1], [0, 0, 1, 1], [], []>} : vector<8x32xf32>, vector<32x128xf32>, vector<8x128xf32> -> vector<8x128xf32>
    %231 = vector.broadcast %7 : vector<1x128xf32> to vector<8x128xf32>
    %232 = arith.addf %230, %231 : vector<8x128xf32>
    %233 = math.tanh %232 : vector<8x128xf32>
    %234 = vector.extract_strided_slice %233 {offsets = [0, 0], sizes = [8, 8], strides = [1, 1]} : vector<8x128xf32> to vector<8x8xf32>
    %235 = vector.shape_cast %234 : vector<8x8xf32> to vector<8x1x8xf32>
    %c0_56 = arith.constant 0 : index
    %c0_57 = arith.constant 0 : index
    %c0_58 = arith.constant 0 : index
    %236 = vector.load %arg9[%c0_56, %c0_57, %c0_58] : memref<8x8x8xf32, #tpu.memory_space<vmem>>, vector<8x1x8xf32>
    tpu.vector_store %arg9[%c0_56, %c0_57, %c0_58], %235 {strides = array<i32>} : memref<8x8x8xf32, #tpu.memory_space<vmem>>, vector<8x1x8xf32>,
    %cst_59 = arith.constant dense<0.000000e+00> : vector<8x128xf32>
    %237 = tpu.matmul %229, %3, %cst_59 {dimension_numbers = #tpu.dot_dimension_numbers<[1], [0], [0], [1], [0, 0, 1, 1], [], []>} : vector<8x32xf32>, vector<32x128xf32>, vector<8x128xf32> -> vector<8x128xf32>
    %238 = arith.addf %60, %237 : vector<8x128xf32>
    %239 = arith.negf %238 : vector<8x128xf32>
    %240 = math.exp %239 : vector<8x128xf32>
    %cst_60 = arith.constant 1.000000e+00 : f32
    %241 = vector.broadcast %cst_60 : f32 to vector<8x128xf32>
    %242 = arith.addf %241, %240 : vector<8x128xf32>
    %243 = arith.divf %241, %242 : vector<8x128xf32>
    %244 = vector.extract_strided_slice %238 {offsets = [0, 64], sizes = [8, 32], strides = [1, 1]} : vector<8x128xf32> to vector<8x32xf32>
    %245 = math.tanh %244 : vector<8x32xf32>
    %246 = vector.extract_strided_slice %243 {offsets = [0, 0], sizes = [8, 32], strides = [1, 1]} : vector<8x128xf32> to vector<8x32xf32>
    %247 = vector.extract_strided_slice %243 {offsets = [0, 32], sizes = [8, 32], strides = [1, 1]} : vector<8x128xf32> to vector<8x32xf32>
    %248 = vector.extract_strided_slice %243 {offsets = [0, 96], sizes = [8, 32], strides = [1, 1]} : vector<8x128xf32> to vector<8x32xf32>
    %249 = arith.mulf %247, %227 : vector<8x32xf32>
    %250 = arith.mulf %246, %245 : vector<8x32xf32>
    %251 = arith.addf %249, %250 : vector<8x32xf32>
    %252 = math.tanh %251 : vector<8x32xf32>
    %253 = arith.mulf %248, %252 : vector<8x32xf32>
    %cst_61 = arith.constant dense<0.000000e+00> : vector<8x128xf32>
    %254 = tpu.matmul %253, %6, %cst_61 {dimension_numbers = #tpu.dot_dimension_numbers<[1], [0], [0], [1], [0, 0, 1, 1], [], []>} : vector<8x32xf32>, vector<32x128xf32>, vector<8x128xf32> -> vector<8x128xf32>
    %255 = vector.broadcast %7 : vector<1x128xf32> to vector<8x128xf32>
    %256 = arith.addf %254, %255 : vector<8x128xf32>
    %257 = math.tanh %256 : vector<8x128xf32>
    %258 = vector.extract_strided_slice %257 {offsets = [0, 0], sizes = [8, 8], strides = [1, 1]} : vector<8x128xf32> to vector<8x8xf32>
    %259 = vector.shape_cast %258 : vector<8x8xf32> to vector<8x1x8xf32>
    %c0_62 = arith.constant 0 : index
    %c1 = arith.constant 1 : index
    %c0_63 = arith.constant 0 : index
    %260 = vector.load %arg9[%c0_62, %c1, %c0_63] : memref<8x8x8xf32, #tpu.memory_space<vmem>>, vector<8x1x8xf32>
    tpu.vector_store %arg9[%c0_62, %c1, %c0_63], %259 {strides = array<i32>} : memref<8x8x8xf32, #tpu.memory_space<vmem>>, vector<8x1x8xf32>,
    %cst_64 = arith.constant dense<0.000000e+00> : vector<8x128xf32>
    %261 = tpu.matmul %253, %3, %cst_64 {dimension_numbers = #tpu.dot_dimension_numbers<[1], [0], [0], [1], [0, 0, 1, 1], [], []>} : vector<8x32xf32>, vector<32x128xf32>, vector<8x128xf32> -> vector<8x128xf32>
    %262 = arith.addf %85, %261 : vector<8x128xf32>
    %263 = arith.negf %262 : vector<8x128xf32>
    %264 = math.exp %263 : vector<8x128xf32>
    %cst_65 = arith.constant 1.000000e+00 : f32
    %265 = vector.broadcast %cst_65 : f32 to vector<8x128xf32>
    %266 = arith.addf %265, %264 : vector<8x128xf32>
    %267 = arith.divf %265, %266 : vector<8x128xf32>
    %268 = vector.extract_strided_slice %262 {offsets = [0, 64], sizes = [8, 32], strides = [1, 1]} : vector<8x128xf32> to vector<8x32xf32>
    %269 = math.tanh %268 : vector<8x32xf32>
    %270 = vector.extract_strided_slice %267 {offsets = [0, 0], sizes = [8, 32], strides = [1, 1]} : vector<8x128xf32> to vector<8x32xf32>
    %271 = vector.extract_strided_slice %267 {offsets = [0, 32], sizes = [8, 32], strides = [1, 1]} : vector<8x128xf32> to vector<8x32xf32>
    %272 = vector.extract_strided_slice %267 {offsets = [0, 96], sizes = [8, 32], strides = [1, 1]} : vector<8x128xf32> to vector<8x32xf32>
    %273 = arith.mulf %271, %251 : vector<8x32xf32>
    %274 = arith.mulf %270, %269 : vector<8x32xf32>
    %275 = arith.addf %273, %274 : vector<8x32xf32>
    %276 = math.tanh %275 : vector<8x32xf32>
    %277 = arith.mulf %272, %276 : vector<8x32xf32>
    %cst_66 = arith.constant dense<0.000000e+00> : vector<8x128xf32>
    %278 = tpu.matmul %277, %6, %cst_66 {dimension_numbers = #tpu.dot_dimension_numbers<[1], [0], [0], [1], [0, 0, 1, 1], [], []>} : vector<8x32xf32>, vector<32x128xf32>, vector<8x128xf32> -> vector<8x128xf32>
    %279 = vector.broadcast %7 : vector<1x128xf32> to vector<8x128xf32>
    %280 = arith.addf %278, %279 : vector<8x128xf32>
    %281 = math.tanh %280 : vector<8x128xf32>
    %282 = vector.extract_strided_slice %281 {offsets = [0, 0], sizes = [8, 8], strides = [1, 1]} : vector<8x128xf32> to vector<8x8xf32>
    %283 = vector.shape_cast %282 : vector<8x8xf32> to vector<8x1x8xf32>
    %c0_67 = arith.constant 0 : index
    %c2 = arith.constant 2 : index
    %c0_68 = arith.constant 0 : index
    %284 = vector.load %arg9[%c0_67, %c2, %c0_68] : memref<8x8x8xf32, #tpu.memory_space<vmem>>, vector<8x1x8xf32>
    tpu.vector_store %arg9[%c0_67, %c2, %c0_68], %283 {strides = array<i32>} : memref<8x8x8xf32, #tpu.memory_space<vmem>>, vector<8x1x8xf32>,
    %cst_69 = arith.constant dense<0.000000e+00> : vector<8x128xf32>
    %285 = tpu.matmul %277, %3, %cst_69 {dimension_numbers = #tpu.dot_dimension_numbers<[1], [0], [0], [1], [0, 0, 1, 1], [], []>} : vector<8x32xf32>, vector<32x128xf32>, vector<8x128xf32> -> vector<8x128xf32>
    %286 = arith.addf %110, %285 : vector<8x128xf32>
    %287 = arith.negf %286 : vector<8x128xf32>
    %288 = math.exp %287 : vector<8x128xf32>
    %cst_70 = arith.constant 1.000000e+00 : f32
    %289 = vector.broadcast %cst_70 : f32 to vector<8x128xf32>
    %290 = arith.addf %289, %288 : vector<8x128xf32>
    %291 = arith.divf %289, %290 : vector<8x128xf32>
    %292 = vector.extract_strided_slice %286 {offsets = [0, 64], sizes = [8, 32], strides = [1, 1]} : vector<8x128xf32> to vector<8x32xf32>
    %293 = math.tanh %292 : vector<8x32xf32>
    %294 = vector.extract_strided_slice %291 {offsets = [0, 0], sizes = [8, 32], strides = [1, 1]} : vector<8x128xf32> to vector<8x32xf32>
    %295 = vector.extract_strided_slice %291 {offsets = [0, 32], sizes = [8, 32], strides = [1, 1]} : vector<8x128xf32> to vector<8x32xf32>
    %296 = vector.extract_strided_slice %291 {offsets = [0, 96], sizes = [8, 32], strides = [1, 1]} : vector<8x128xf32> to vector<8x32xf32>
    %297 = arith.mulf %295, %275 : vector<8x32xf32>
    %298 = arith.mulf %294, %293 : vector<8x32xf32>
    %299 = arith.addf %297, %298 : vector<8x32xf32>
    %300 = math.tanh %299 : vector<8x32xf32>
    %301 = arith.mulf %296, %300 : vector<8x32xf32>
    %cst_71 = arith.constant dense<0.000000e+00> : vector<8x128xf32>
    %302 = tpu.matmul %301, %6, %cst_71 {dimension_numbers = #tpu.dot_dimension_numbers<[1], [0], [0], [1], [0, 0, 1, 1], [], []>} : vector<8x32xf32>, vector<32x128xf32>, vector<8x128xf32> -> vector<8x128xf32>
    %303 = vector.broadcast %7 : vector<1x128xf32> to vector<8x128xf32>
    %304 = arith.addf %302, %303 : vector<8x128xf32>
    %305 = math.tanh %304 : vector<8x128xf32>
    %306 = vector.extract_strided_slice %305 {offsets = [0, 0], sizes = [8, 8], strides = [1, 1]} : vector<8x128xf32> to vector<8x8xf32>
    %307 = vector.shape_cast %306 : vector<8x8xf32> to vector<8x1x8xf32>
    %c0_72 = arith.constant 0 : index
    %c3 = arith.constant 3 : index
    %c0_73 = arith.constant 0 : index
    %308 = vector.load %arg9[%c0_72, %c3, %c0_73] : memref<8x8x8xf32, #tpu.memory_space<vmem>>, vector<8x1x8xf32>
    tpu.vector_store %arg9[%c0_72, %c3, %c0_73], %307 {strides = array<i32>} : memref<8x8x8xf32, #tpu.memory_space<vmem>>, vector<8x1x8xf32>,
    %cst_74 = arith.constant dense<0.000000e+00> : vector<8x128xf32>
    %309 = tpu.matmul %301, %3, %cst_74 {dimension_numbers = #tpu.dot_dimension_numbers<[1], [0], [0], [1], [0, 0, 1, 1], [], []>} : vector<8x32xf32>, vector<32x128xf32>, vector<8x128xf32> -> vector<8x128xf32>
    %310 = arith.addf %135, %309 : vector<8x128xf32>
    %311 = arith.negf %310 : vector<8x128xf32>
    %312 = math.exp %311 : vector<8x128xf32>
    %cst_75 = arith.constant 1.000000e+00 : f32
    %313 = vector.broadcast %cst_75 : f32 to vector<8x128xf32>
    %314 = arith.addf %313, %312 : vector<8x128xf32>
    %315 = arith.divf %313, %314 : vector<8x128xf32>
    %316 = vector.extract_strided_slice %310 {offsets = [0, 64], sizes = [8, 32], strides = [1, 1]} : vector<8x128xf32> to vector<8x32xf32>
    %317 = math.tanh %316 : vector<8x32xf32>
    %318 = vector.extract_strided_slice %315 {offsets = [0, 0], sizes = [8, 32], strides = [1, 1]} : vector<8x128xf32> to vector<8x32xf32>
    %319 = vector.extract_strided_slice %315 {offsets = [0, 32], sizes = [8, 32], strides = [1, 1]} : vector<8x128xf32> to vector<8x32xf32>
    %320 = vector.extract_strided_slice %315 {offsets = [0, 96], sizes = [8, 32], strides = [1, 1]} : vector<8x128xf32> to vector<8x32xf32>
    %321 = arith.mulf %319, %299 : vector<8x32xf32>
    %322 = arith.mulf %318, %317 : vector<8x32xf32>
    %323 = arith.addf %321, %322 : vector<8x32xf32>
    %324 = math.tanh %323 : vector<8x32xf32>
    %325 = arith.mulf %320, %324 : vector<8x32xf32>
    %cst_76 = arith.constant dense<0.000000e+00> : vector<8x128xf32>
    %326 = tpu.matmul %325, %6, %cst_76 {dimension_numbers = #tpu.dot_dimension_numbers<[1], [0], [0], [1], [0, 0, 1, 1], [], []>} : vector<8x32xf32>, vector<32x128xf32>, vector<8x128xf32> -> vector<8x128xf32>
    %327 = vector.broadcast %7 : vector<1x128xf32> to vector<8x128xf32>
    %328 = arith.addf %326, %327 : vector<8x128xf32>
    %329 = math.tanh %328 : vector<8x128xf32>
    %330 = vector.extract_strided_slice %329 {offsets = [0, 0], sizes = [8, 8], strides = [1, 1]} : vector<8x128xf32> to vector<8x8xf32>
    %331 = vector.shape_cast %330 : vector<8x8xf32> to vector<8x1x8xf32>
    %c0_77 = arith.constant 0 : index
    %c4 = arith.constant 4 : index
    %c0_78 = arith.constant 0 : index
    %332 = vector.load %arg9[%c0_77, %c4, %c0_78] : memref<8x8x8xf32, #tpu.memory_space<vmem>>, vector<8x1x8xf32>
    tpu.vector_store %arg9[%c0_77, %c4, %c0_78], %331 {strides = array<i32>} : memref<8x8x8xf32, #tpu.memory_space<vmem>>, vector<8x1x8xf32>,
    %cst_79 = arith.constant dense<0.000000e+00> : vector<8x128xf32>
    %333 = tpu.matmul %325, %3, %cst_79 {dimension_numbers = #tpu.dot_dimension_numbers<[1], [0], [0], [1], [0, 0, 1, 1], [], []>} : vector<8x32xf32>, vector<32x128xf32>, vector<8x128xf32> -> vector<8x128xf32>
    %334 = arith.addf %160, %333 : vector<8x128xf32>
    %335 = arith.negf %334 : vector<8x128xf32>
    %336 = math.exp %335 : vector<8x128xf32>
    %cst_80 = arith.constant 1.000000e+00 : f32
    %337 = vector.broadcast %cst_80 : f32 to vector<8x128xf32>
    %338 = arith.addf %337, %336 : vector<8x128xf32>
    %339 = arith.divf %337, %338 : vector<8x128xf32>
    %340 = vector.extract_strided_slice %334 {offsets = [0, 64], sizes = [8, 32], strides = [1, 1]} : vector<8x128xf32> to vector<8x32xf32>
    %341 = math.tanh %340 : vector<8x32xf32>
    %342 = vector.extract_strided_slice %339 {offsets = [0, 0], sizes = [8, 32], strides = [1, 1]} : vector<8x128xf32> to vector<8x32xf32>
    %343 = vector.extract_strided_slice %339 {offsets = [0, 32], sizes = [8, 32], strides = [1, 1]} : vector<8x128xf32> to vector<8x32xf32>
    %344 = vector.extract_strided_slice %339 {offsets = [0, 96], sizes = [8, 32], strides = [1, 1]} : vector<8x128xf32> to vector<8x32xf32>
    %345 = arith.mulf %343, %323 : vector<8x32xf32>
    %346 = arith.mulf %342, %341 : vector<8x32xf32>
    %347 = arith.addf %345, %346 : vector<8x32xf32>
    %348 = math.tanh %347 : vector<8x32xf32>
    %349 = arith.mulf %344, %348 : vector<8x32xf32>
    %cst_81 = arith.constant dense<0.000000e+00> : vector<8x128xf32>
    %350 = tpu.matmul %349, %6, %cst_81 {dimension_numbers = #tpu.dot_dimension_numbers<[1], [0], [0], [1], [0, 0, 1, 1], [], []>} : vector<8x32xf32>, vector<32x128xf32>, vector<8x128xf32> -> vector<8x128xf32>
    %351 = vector.broadcast %7 : vector<1x128xf32> to vector<8x128xf32>
    %352 = arith.addf %350, %351 : vector<8x128xf32>
    %353 = math.tanh %352 : vector<8x128xf32>
    %354 = vector.extract_strided_slice %353 {offsets = [0, 0], sizes = [8, 8], strides = [1, 1]} : vector<8x128xf32> to vector<8x8xf32>
    %355 = vector.shape_cast %354 : vector<8x8xf32> to vector<8x1x8xf32>
    %c0_82 = arith.constant 0 : index
    %c5 = arith.constant 5 : index
    %c0_83 = arith.constant 0 : index
    %356 = vector.load %arg9[%c0_82, %c5, %c0_83] : memref<8x8x8xf32, #tpu.memory_space<vmem>>, vector<8x1x8xf32>
    tpu.vector_store %arg9[%c0_82, %c5, %c0_83], %355 {strides = array<i32>} : memref<8x8x8xf32, #tpu.memory_space<vmem>>, vector<8x1x8xf32>,
    %cst_84 = arith.constant dense<0.000000e+00> : vector<8x128xf32>
    %357 = tpu.matmul %349, %3, %cst_84 {dimension_numbers = #tpu.dot_dimension_numbers<[1], [0], [0], [1], [0, 0, 1, 1], [], []>} : vector<8x32xf32>, vector<32x128xf32>, vector<8x128xf32> -> vector<8x128xf32>
    %358 = arith.addf %185, %357 : vector<8x128xf32>
    %359 = arith.negf %358 : vector<8x128xf32>
    %360 = math.exp %359 : vector<8x128xf32>
    %cst_85 = arith.constant 1.000000e+00 : f32
    %361 = vector.broadcast %cst_85 : f32 to vector<8x128xf32>
    %362 = arith.addf %361, %360 : vector<8x128xf32>
    %363 = arith.divf %361, %362 : vector<8x128xf32>
    %364 = vector.extract_strided_slice %358 {offsets = [0, 64], sizes = [8, 32], strides = [1, 1]} : vector<8x128xf32> to vector<8x32xf32>
    %365 = math.tanh %364 : vector<8x32xf32>
    %366 = vector.extract_strided_slice %363 {offsets = [0, 0], sizes = [8, 32], strides = [1, 1]} : vector<8x128xf32> to vector<8x32xf32>
    %367 = vector.extract_strided_slice %363 {offsets = [0, 32], sizes = [8, 32], strides = [1, 1]} : vector<8x128xf32> to vector<8x32xf32>
    %368 = vector.extract_strided_slice %363 {offsets = [0, 96], sizes = [8, 32], strides = [1, 1]} : vector<8x128xf32> to vector<8x32xf32>
    %369 = arith.mulf %367, %347 : vector<8x32xf32>
    %370 = arith.mulf %366, %365 : vector<8x32xf32>
    %371 = arith.addf %369, %370 : vector<8x32xf32>
    %372 = math.tanh %371 : vector<8x32xf32>
    %373 = arith.mulf %368, %372 : vector<8x32xf32>
    %cst_86 = arith.constant dense<0.000000e+00> : vector<8x128xf32>
    %374 = tpu.matmul %373, %6, %cst_86 {dimension_numbers = #tpu.dot_dimension_numbers<[1], [0], [0], [1], [0, 0, 1, 1], [], []>} : vector<8x32xf32>, vector<32x128xf32>, vector<8x128xf32> -> vector<8x128xf32>
    %375 = vector.broadcast %7 : vector<1x128xf32> to vector<8x128xf32>
    %376 = arith.addf %374, %375 : vector<8x128xf32>
    %377 = math.tanh %376 : vector<8x128xf32>
    %378 = vector.extract_strided_slice %377 {offsets = [0, 0], sizes = [8, 8], strides = [1, 1]} : vector<8x128xf32> to vector<8x8xf32>
    %379 = vector.shape_cast %378 : vector<8x8xf32> to vector<8x1x8xf32>
    %c0_87 = arith.constant 0 : index
    %c6 = arith.constant 6 : index
    %c0_88 = arith.constant 0 : index
    %380 = vector.load %arg9[%c0_87, %c6, %c0_88] : memref<8x8x8xf32, #tpu.memory_space<vmem>>, vector<8x1x8xf32>
    tpu.vector_store %arg9[%c0_87, %c6, %c0_88], %379 {strides = array<i32>} : memref<8x8x8xf32, #tpu.memory_space<vmem>>, vector<8x1x8xf32>,
    %cst_89 = arith.constant dense<0.000000e+00> : vector<8x128xf32>
    %381 = tpu.matmul %373, %3, %cst_89 {dimension_numbers = #tpu.dot_dimension_numbers<[1], [0], [0], [1], [0, 0, 1, 1], [], []>} : vector<8x32xf32>, vector<32x128xf32>, vector<8x128xf32> -> vector<8x128xf32>
    %382 = arith.addf %210, %381 : vector<8x128xf32>
    %383 = arith.negf %382 : vector<8x128xf32>
    %384 = math.exp %383 : vector<8x128xf32>
    %cst_90 = arith.constant 1.000000e+00 : f32
    %385 = vector.broadcast %cst_90 : f32 to vector<8x128xf32>
    %386 = arith.addf %385, %384 : vector<8x128xf32>
    %387 = arith.divf %385, %386 : vector<8x128xf32>
    %388 = vector.extract_strided_slice %382 {offsets = [0, 64], sizes = [8, 32], strides = [1, 1]} : vector<8x128xf32> to vector<8x32xf32>
    %389 = math.tanh %388 : vector<8x32xf32>
    %390 = vector.extract_strided_slice %387 {offsets = [0, 0], sizes = [8, 32], strides = [1, 1]} : vector<8x128xf32> to vector<8x32xf32>
    %391 = vector.extract_strided_slice %387 {offsets = [0, 32], sizes = [8, 32], strides = [1, 1]} : vector<8x128xf32> to vector<8x32xf32>
    %392 = vector.extract_strided_slice %387 {offsets = [0, 96], sizes = [8, 32], strides = [1, 1]} : vector<8x128xf32> to vector<8x32xf32>
    %393 = arith.mulf %391, %371 : vector<8x32xf32>
    %394 = arith.mulf %390, %389 : vector<8x32xf32>
    %395 = arith.addf %393, %394 : vector<8x32xf32>
    %396 = math.tanh %395 : vector<8x32xf32>
    %397 = arith.mulf %392, %396 : vector<8x32xf32>
    %cst_91 = arith.constant dense<0.000000e+00> : vector<8x128xf32>
    %398 = tpu.matmul %397, %6, %cst_91 {dimension_numbers = #tpu.dot_dimension_numbers<[1], [0], [0], [1], [0, 0, 1, 1], [], []>} : vector<8x32xf32>, vector<32x128xf32>, vector<8x128xf32> -> vector<8x128xf32>
    %399 = vector.broadcast %7 : vector<1x128xf32> to vector<8x128xf32>
    %400 = arith.addf %398, %399 : vector<8x128xf32>
    %401 = math.tanh %400 : vector<8x128xf32>
    %402 = vector.extract_strided_slice %401 {offsets = [0, 0], sizes = [8, 8], strides = [1, 1]} : vector<8x128xf32> to vector<8x8xf32>
    %403 = vector.shape_cast %402 : vector<8x8xf32> to vector<8x1x8xf32>
    %c0_92 = arith.constant 0 : index
    %c7 = arith.constant 7 : index
    %c0_93 = arith.constant 0 : index
    %404 = vector.load %arg9[%c0_92, %c7, %c0_93] : memref<8x8x8xf32, #tpu.memory_space<vmem>>, vector<8x1x8xf32>
    tpu.vector_store %arg9[%c0_92, %c7, %c0_93], %403 {strides = array<i32>} : memref<8x8x8xf32, #tpu.memory_space<vmem>>, vector<8x1x8xf32>,
    return
  }
}

</mosaic_0001>

<bundles_post_ra>
// kernel: tpu_custom_call.1
= control target key start
LH: loop header
LB: loop body
LE: loop exit
PB: predicated region body
PF: predicated region fallthrough
CT: control target
= control target key end

     0   :  { %14 = vsyncpa [#allocation3], 0  ;;  %s6221_s0 = inlined_call_operand.hbm [shape: f32[8,8,16], index: 0, kind: input, shape index: {}]   ;;  %s6222_s1 = inlined_call_operand.hbm [shape: f32[16,128], index: 1, kind: input, shape index: {}]   ;;  %s6223_s2 = inlined_call_operand.hbm [shape: f32[32,128], index: 2, kind: input, shape index: {}]   ;;  %s6224_s3 = inlined_call_operand.vmem [shape: f32[1,128], index: 3, kind: input, shape index: {}]   ;;  %s6225_s4 = inlined_call_operand.hbm [shape: f32[32,128], index: 4, kind: input, shape index: {}]   ;;  %s6226_s5 = inlined_call_operand.hbm [shape: f32[32,128], index: 5, kind: input, shape index: {}]   ;;  %s6227_s6 = inlined_call_operand.vmem [shape: f32[1,128], index: 6, kind: input, shape index: {}]   ;;  %s6228_s7 = inlined_call_operand.hbm [shape: f32[32,128], index: 7, kind: input, shape index: {}]   ;;  %s6229_s8 = inlined_call_operand.vmem [shape: f32[1,128], index: 8, kind: input, shape index: {}]   ;;  %s6230_s9 = inlined_call_operand.hbm [shape: f32[8,8,8], index: 9, kind: output, shape index: {}]  }
   0x1   :  { %15 = vsyncpa [#allocation6], 0 }
   0x2   :  { %16 = vsyncpa [#allocation9], 0 }
   0x3   :  { %17 = vsyncpa [#allocation12], 0 }
   0x4   :  { %18 = vsyncpa [#allocation4], 0  ;;  %s5383_s30 = smov [#allocation5]   ;;  %s5384_s11 = smov [#allocation8]  }
   0x5   :  { %s36_s10 = sshll.u32 %s5383_s30, 4  ;;  %s62_s12 = sshll.u32 %s5384_s11, 4  ;;  %s37_s10 = int_to_ptr.vmem [resolvable:$true] %s36_s10  ;;  %s5448_s12 = int_to_ptr.vmem [resolvable:$true] %s62_s12 }
   0x6   :  { %s5219_s15 = scalar_lea.hbm %s6222_s1, 256 }
   0x7   :  { %p5220_p0 = scmp.ne.s32.totalorder %s6222_s1, %s5219_s15  ;;  %p5223_p1 = scmp.lt.u32.totalorder %s5219_s15, %s6222_s1 }
   0x9   :  { %p5225_p2 = pnand %p5223_p1, %p5220_p0 }
   0xb   :  { %5228 = shalt.err (!%p5225_p2)
}
   0xc   :  { %s5229_s20 = scalar_lea.vmem %s37_s10, 256  ;;  %p5234_p4 = scmp.lt.s32.totalorder %s37_s10, %s37_s10 }
   0xd   :  { %p5230_p3 = scmp.ne.s32.totalorder %s37_s10, %s5229_s20  ;;  %p5235_p5 = scmp.lt.s32.totalorder %s5229_s20, %s5229_s20 }
   0xf   :  { %p5236_p6 = por %p5235_p5, %p5234_p4 }
  0x11   :  { %p5237_p7 = pnand %p5236_p6, %p5230_p3 }
  0x13   :  { %5240 = shalt.err (!%p5237_p7)
}
  0x14   :  { %s5385_s21 = smov 128   ;;  %s5386_s22 = smov 8  }
  0x15   :  { %42 = dma.hbm_to_vmem [thread:$0]  %s6222_s1, 256, %s37_s10, [#allocation6], %s5385_s21, %s5385_s21, %s5386_s22  }
  0x16   :  { %s5241_s27 = scalar_lea.hbm %s6225_s4, 512 }
  0x17   :  { %p5242_p8 = scmp.ne.s32.totalorder %s6225_s4, %s5241_s27  ;;  %p5245_p9 = scmp.lt.u32.totalorder %s5241_s27, %s6225_s4 }
  0x19   :  { %p5247_p10 = pnand %p5245_p9, %p5242_p8 }
  0x1b   :  { %5250 = shalt.err (!%p5247_p10)
}
  0x1c   :  { %s5251_s13 = scalar_lea.vmem %s5448_s12, 512  ;;  %p5256_p12 = scmp.lt.s32.totalorder %s5448_s12, %s5448_s12 }
  0x1d   :  { %p5252_p11 = scmp.ne.s32.totalorder %s5448_s12, %s5251_s13  ;;  %p5257_p13 = scmp.lt.s32.totalorder %s5251_s13, %s5251_s13 }
  0x1f   :  { %p5258_p0 = por %p5257_p13, %p5256_p12 }
  0x21   :  { %p5259_p1 = pnand %p5258_p0, %p5252_p11 }
  0x23   :  { %5262 = shalt.err (!%p5259_p1)
}
  0x24   :  { %68 = dma.hbm_to_vmem [thread:$0]  %s6225_s4, 512, %s5448_s12, [#allocation9], %s5385_s21, %s5385_s21, %s5386_s22  }
  0x25   :  { %s5387_s14 = smov [#allocation2]   ;;  %s5388_s16 = smov [#allocation7]  }
  0x26   :  { %s24_s15 = sshll.u32 %s5387_s14, 4  ;;  %s48_s17 = sshll.u32 %s5388_s16, 4  ;;  %s25_s15 = int_to_ptr.vmem [resolvable:$true] %s24_s15  ;;  %s5485_s17 = int_to_ptr.vmem [resolvable:$true] %s48_s17 }
  0x27   :  { %s5263_s20 = scalar_lea.hbm %s6221_s0, 1024 }
  0x28   :  { %p5264_p2 = scmp.ne.s32.totalorder %s6221_s0, %s5263_s20  ;;  %p5267_p3 = scmp.lt.u32.totalorder %s5263_s20, %s6221_s0 }
  0x2a   :  { %p5269_p4 = pnand %p5267_p3, %p5264_p2 }
  0x2c   :  { %5272 = shalt.err (!%p5269_p4)
}
  0x2d   :  { %s5273_s4 = scalar_lea.vmem %s25_s15, 1024  ;;  %p5278_p6 = scmp.lt.s32.totalorder %s25_s15, %s25_s15 }
  0x2e   :  { %p5274_p5 = scmp.ne.s32.totalorder %s25_s15, %s5273_s4  ;;  %p5279_p7 = scmp.lt.s32.totalorder %s5273_s4, %s5273_s4 }
  0x30   :  { %p5280_p8 = por %p5279_p7, %p5278_p6 }
  0x32   :  { %p5281_p9 = pnand %p5280_p8, %p5274_p5 }
  0x34   :  { %5284 = shalt.err (!%p5281_p9)
}
  0x35   :  { %30 = dma.hbm_to_vmem [thread:$0]  %s6221_s0, 1024, %s25_s15, [#allocation3], %s5385_s21, %s5385_s21, %s5386_s22  }
  0x36   :  { %s5285_s30 = scalar_lea.hbm %s6223_s2, 512 }
  0x37   :  { %p5286_p10 = scmp.ne.s32.totalorder %s6223_s2, %s5285_s30  ;;  %p5289_p11 = scmp.lt.u32.totalorder %s5285_s30, %s6223_s2 }
  0x39   :  { %p5291_p12 = pnand %p5289_p11, %p5286_p10 }
  0x3b   :  { %5294 = shalt.err (!%p5291_p12)
}
  0x3c   :  { %s5295_s14 = scalar_lea.vmem %s5485_s17, 512  ;;  %p5300_p0 = scmp.lt.s32.totalorder %s5485_s17, %s5485_s17 }
  0x3d   :  { %p5296_p13 = scmp.ne.s32.totalorder %s5485_s17, %s5295_s14  ;;  %p5301_p1 = scmp.lt.s32.totalorder %s5295_s14, %s5295_s14 }
  0x3f   :  { %p5302_p2 = por %p5301_p1, %p5300_p0 }
  0x41   :  { %p5303_p3 = pnand %p5302_p2, %p5296_p13 }
  0x43   :  { %5306 = shalt.err (!%p5303_p3)
}
  0x44   :  { %54 = dma.hbm_to_vmem [thread:$0]  %s6223_s2, 512, %s5485_s17, [#allocation6], %s5385_s21, %s5385_s21, %s5386_s22  }
  0x45   :  { %s5389_s16 = smov [#allocation10]   ;;  %s5390_s19 = smov [#allocation11]  }
  0x46   :  { %s74_s18 = sshll.u32 %s5389_s16, 4  ;;  %s88_s20 = sshll.u32 %s5390_s19, 4  ;;  %s75_s18 = int_to_ptr.vmem [resolvable:$true] %s74_s18  ;;  %s5522_s20 = int_to_ptr.vmem [resolvable:$true] %s88_s20 }
  0x47   :  { %s5307_s25 = scalar_lea.hbm %s6226_s5, 512 }
  0x48   :  { %p5308_p4 = scmp.ne.s32.totalorder %s6226_s5, %s5307_s25  ;;  %p5311_p5 = scmp.lt.u32.totalorder %s5307_s25, %s6226_s5 }
  0x4a   :  { %p5313_p6 = pnand %p5311_p5, %p5308_p4 }
  0x4c   :  { %5316 = shalt.err (!%p5313_p6)
}
  0x4d   :  { %s5317_s2 = scalar_lea.vmem %s75_s18, 512  ;;  %p5322_p8 = scmp.lt.s32.totalorder %s75_s18, %s75_s18 }
  0x4e   :  { %p5318_p7 = scmp.ne.s32.totalorder %s75_s18, %s5317_s2  ;;  %p5323_p9 = scmp.lt.s32.totalorder %s5317_s2, %s5317_s2 }
  0x50   :  { %p5324_p10 = por %p5323_p9, %p5322_p8 }
  0x52   :  { %p5325_p11 = pnand %p5324_p10, %p5318_p7 }
  0x54   :  { %5328 = shalt.err (!%p5325_p11)
}
  0x55   :  { %80 = dma.hbm_to_vmem [thread:$0]  %s6226_s5, 512, %s75_s18, [#allocation9], %s5385_s21, %s5385_s21, %s5386_s22  }
  0x56   :  { %s5329_s11 = scalar_lea.hbm %s6228_s7, 512 }
  0x57   :  { %p5330_p12 = scmp.ne.s32.totalorder %s6228_s7, %s5329_s11  ;;  %p5333_p13 = scmp.lt.u32.totalorder %s5329_s11, %s6228_s7 }
  0x59   :  { %p5335_p0 = pnand %p5333_p13, %p5330_p12 }
  0x5b   :  { %5338 = shalt.err (!%p5335_p0)
}
  0x5c   :  { %s5339_s0 = scalar_lea.vmem %s5522_s20, 512  ;;  %p5344_p2 = scmp.lt.s32.totalorder %s5522_s20, %s5522_s20 }
  0x5d   :  { %p5340_p1 = scmp.ne.s32.totalorder %s5522_s20, %s5339_s0  ;;  %p5345_p3 = scmp.lt.s32.totalorder %s5339_s0, %s5339_s0 }
  0x5f   :  { %p5346_p4 = por %p5345_p3, %p5344_p2 }
  0x61   :  { %p5347_p5 = pnand %p5346_p4, %p5340_p1 }
  0x63   :  { %5350 = shalt.err (!%p5347_p5)
}
  0x64   :  { %94 = dma.hbm_to_vmem [thread:$0]  %s6228_s7, 512, %s5522_s20, [#allocation12], %s5385_s21, %s5385_s21, %s5386_s22  }
  0x65   :  { %5373 = dma.done.wait [#allocation3], 1024  }
  0x66   :  { %5374 = vsyncadd [#allocation3], 4294966272 }
  0x67   :  { %5375 = dma.done.wait [#allocation6], 768  }
  0x68   :  { %5376 = vsyncadd [#allocation6], 4294966528 }
  0x69   :  { %5377 = dma.done.wait [#allocation9], 1024  }
  0x6a   :  { %5378 = vsyncadd [#allocation9], 4294966272 }
  0x6b   :  { %5379 = dma.done.wait [#allocation12], 512  }
  0x6c   :  { %5380 = vsyncadd [#allocation12], 4294966784  ;;  %v5391_v0 = vmov 0.0|0.0   ;;  %vm5392_vm0 = vmmov 0   ;;  %v5393_v1 = vmov 0.0   ;;  %v115_v2 = vld [vmem:[#allocation5] sm:$0xff] }
  0x6d   :  { %4796 = vmatprep.subr.bf16.mxu0 %v5391_v0  ;;  %4392 = vmatprep.mubr.msk.f32.mxu0 %vm5392_vm0, %v5393_v1  ;;  %v116_v3 = vld [vmem:[#allocation5 + $0x8] sm:$0xff]  ;;  %v5565_v4 = vld [vmem:[#allocation2] sm:$0xff]  ;;  %v5571_v7 = vld [vmem:[#allocation2 + $0x10] sm:$0xff]  ;;  %vm159_vm1 = vcmask 1041409   ;;  %vm162_vm2 = vcmask 1042434   ;;  %vm165_vm3 = vcmask 1043459  }
  0x6e   :  { %4805 = vmatprep.subr.bf16.mxu1 %v5391_v0  ;;  %4414 = vmatprep.mubr.msk.f32.mxu1 %vm5392_vm0, %v5393_v1  ;;  %v5567_v5 = vpack.c.bf16 %v116_v3, %v115_v2  ;;  %v5569_v6 = vld [vmem:[#allocation2 + $0x8] sm:$0xff]  ;;  %v5573_v8 = vld [vmem:[#allocation2 + $0x18] sm:$0xff]  ;;  %v5575_v9 = vld [vmem:[#allocation2 + $0x20] sm:$0xff]  ;;  %v161_v13 = vrot.slane %v5571_v7, 6  ;;  %vm168_vm4 = vcmask 1044484   ;;  %vm171_vm5 = vcmask 1045509  }
  0x6f   :  { %v5577_v10 = vld [vmem:[#allocation2 + $0x28] sm:$0xff]  ;;  %v5579_v11 = vld [vmem:[#allocation2 + $0x30] sm:$0xff]  ;;  %v158_v12 = vrot.slane %v5569_v6, 7  ;;  %v164_v14 = vrot.slane %v5573_v8, 5  ;;  %v5585_v15 = vld [vmem:[#allocation2 + $0x38] sm:$0xff]  ;;  %v167_v16 = vrot.slane %v5575_v9, 4 }
  0x70   :  { %4798 = vmatpush3.bf16.msra.mxu0 %v5567_v5  ;;  %v170_v18 = vrot.slane %v5577_v10, 3  ;;  %v173_v20 = vrot.slane %v5579_v11, 2  ;;  %v121_v21 = vld [vmem:[#allocation7] sm:$0xff]  ;;  %v122_v22 = vld [vmem:[#allocation7 + $0x8] sm:$0xff]  ;;  %vm174_vm6 = vcmask 1046534   ;;  %v176_v24 = vrot.slane %v5585_v15, 1 }
  0x71   :  { %4799 = vmatprep.subr.bf16.mxu0 %v5391_v0  ;;  %v160_v17 = vsel %vm159_vm1, %v158_v12, %v5565_v4  ;;  %vm177_vm7 = vcmask 1047559   ;;  %vm179_vm8 = vcmask 130048   ;;  %v5598_v27 = vpack.c.bf16 %v122_v22, %v121_v21  ;;  %v123_v29 = vld [vmem:[#allocation7 + $0x10] sm:$0xff]  ;;  %v124_v30 = vld [vmem:[#allocation7 + $0x18] sm:$0xff]  ;;  %s5394_s18 = smov 64   ;;  %s5395_s19 = smov 32  }
  0x72   :  { %v163_v19 = vsel %vm162_vm2, %v161_v13, %v160_v17  ;;  %v5604_v32 = vpack.c.bf16 %v124_v30, %v123_v29  ;;  %v5617_v33 = vld [vmem:[%s6224_s3] ss:$0 sm:$0xff]  ;;  %v117_v47 = vld [vmem:[#allocation8] sm:$0xff]  ;;  %v118_v48 = vld [vmem:[#allocation8 + $0x8] sm:$0xff]  ;;  %v432_v56 = vrot.slane %v5565_v4, 1  ;;  %v434_v57 = vrot.slane %v5571_v7, 7 }
  0x73   :  { %v166_v23 = vsel %vm165_vm3, %v164_v14, %v163_v19  ;;  %v119_v49 = vld [vmem:[#allocation8 + $0x10] sm:$0xff]  ;;  %v5625_v50 = vpack.c.bf16 %v118_v48, %v117_v47  ;;  %v120_v51 = vld [vmem:[#allocation8 + $0x18] sm:$0xff]  ;;  %v436_v59 = vrot.slane %v5573_v8, 6  ;;  %v438_v61 = vrot.slane %v5575_v9, 5 }
  0x74   :  { %v169_v25 = vsel %vm168_vm4, %v167_v16, %v166_v23  ;;  %v5628_v52 = vpack.c.bf16 %v120_v51, %v119_v49  ;;  %v433_v58 = vsel %vm159_vm1, %v5569_v6, %v432_v56  ;;  %v440_v63 = vrot.slane %v5577_v10, 4 }
  0x75   :  { %v172_v26 = vsel %vm171_vm5, %v170_v18, %v169_v25  ;;  %4807 = vmatpush3.bf16.msra.mxu1 %v5625_v50  ;;  %v435_v60 = vsel %vm162_vm2, %v434_v57, %v433_v58  ;;  %v442_v3 = vrot.slane %v5579_v11, 3  ;;  %vm252_vm9 = vcmask 261120  }
  0x76   :  { %v175_v28 = vsel %vm174_vm6, %v173_v20, %v172_v26  ;;  %4808 = vmatprep.subr.bf16.mxu1 %v5391_v0  ;;  %v437_v62 = vsel %vm165_vm3, %v436_v59, %v435_v60  ;;  %v444_v13 = vrot.slane %v5585_v15, 2  ;;  %v700_v48 = vrot.slane %v5585_v15, 3 }
  0x77   :  { %v178_v31 = vsel %vm177_vm7, %v176_v24, %v175_v28  ;;  %v439_v2 = vsel %vm168_vm4, %v438_v61, %v437_v62  ;;  %vm2459_vm10 = vcmask 57344  }
  0x78   :  { %4393 = vmatmul.mubr.msk.f32.vlgmr.msra.gmra.mrb[0].mxu0 %vm179_vm8, %v178_v31  ;;  %v441_v12 = vsel %vm171_vm5, %v440_v63, %v439_v2 }
  0x79   :  { %4801 = vmatpush3.bf16.msra.mxu0 %v5598_v27  ;;  %4403 = vmatprep.mubr.msk.f32.mxu0 %vm5392_vm0, %v5393_v1  ;;  %v443_v14 = vsel %vm174_vm6, %v442_v3, %v441_v12 }
  0x7a   :  { %4802 = vmatprep.subr.bf16.mxu0 %v5391_v0  ;;  %4810 = vmatpush3.bf16.msra.mxu1 %v5628_v52  ;;  %v445_v17 = vsel %vm177_vm7, %v444_v13, %v443_v14 }
  0x7b   :  { %4811 = vmatprep.subr.bf16.mxu1 %v5391_v0 }
  0x7d   :  { %4804 = vmatpush3.bf16.msra.mxu0 %v5604_v32 }
  0x7e   :  { %4820 = vmatprep.subr.bf16.mxu0 %v5391_v0 }
  0x80   :  { %4404 = vmatmul.mubr.f32.vlgmr.msra.gmra.mrb[0].mxu0 %v5393_v1 }
  0x81   :  { %4443 = vmatprep.mubr.msk.f32.mxu0 %vm5392_vm0, %v5393_v1  ;;  %4822 = vmatpush3.bf16.msra.mxu0 %v5625_v50 }
  0x82   :  { %4823 = vmatprep.subr.bf16.mxu0 %v5391_v0 }
  0x85   :  { %4825 = vmatpush3.bf16.msra.mxu0 %v5628_v52 }
  0x86   :  { %4826 = vmatprep.subr.bf16.mxu0 %v5391_v0 }
 0x153   :  { %v322_v34 = vpop.f32.mrb[0].mxu0 }
 0x154   :  { %v5012_v35 = vadd.f32 %v5617_v33, %v322_v34  ;;  %v4405_v36 = vpop.f32.mrb[1].mxu0 }
 0x156   :  { %5075 = vtanh.f32 %v5012_v35  ;;  %v4149_v38 = vmul.f32 -1.442695, %v5012_v35 }
 0x158   :  { %5077 = vpow2.f32 %v4149_v38  ;;  %v689_v38 = vrot.slane %v5569_v6, 1 }
 0x160   :  { %v5076_v37 = vpop.eup %5075 }
 0x161   :  { %336 = vrot.lane.b32.xlu0 %v5076_v37, %s5394_s18  ;;  %v688_v37 = vrot.slane %v5565_v4, 2 }
 0x162   :  { %v5078_v39 = vpop.eup %5077 }
 0x163   :  { %v330_v40 = vadd.f32 1.0, %v5078_v39  ;;  %v690_v39 = vsel %vm159_vm1, %v689_v38, %v688_v37 }
 0x165   :  { %5079 = vrcp.f32 %v330_v40  ;;  %v692_v40 = vrot.slane %v5573_v8, 7 }
 0x16f   :  { %v5080_v41 = vpop.eup %5079 }
 0x170   :  { %v334_v44 = vmul.f32 0.0, %v5080_v41 }
 0x1d3   :  { %v337_v42 = vpop.permute.xlu0 %336 }
 0x1d4   :  { %v339_v43 = vmul.f32 %v5080_v41, %v337_v42  ;;  %v694_v42 = vrot.slane %v5575_v9, 6 }
 0x1d6   :  { %341 = vrot.lane.b32.xlu0 %v339_v43, %s5395_s19 }
 0x248   :  { %v342_v45 = vpop.permute.xlu0 %341 }
 0x249   :  { %v5622_v46 = vadd.f32 %v342_v45, %v334_v44  ;;  %v696_v44 = vrot.slane %v5577_v10, 5 }
 0x24b   :  { %5081 = vtanh.f32 %v5622_v46 }
 0x255   :  { %v5082_v53 = vpop.eup %5081 }
 0x256   :  { %347 = vrot.lane.b32.xlu1 %v5082_v53, %s5394_s18 }
 0x2c8   :  { %v348_v54 = vpop.permute.xlu1 %347 }
 0x2c9   :  { %v350_v55 = vmul.f32 %v5080_v41, %v348_v54  ;;  %v691_v41 = vsel %vm162_vm2, %v5571_v7, %v690_v39 }
 0x2ca   :  { %v693_v43 = vsel %vm165_vm3, %v692_v40, %v691_v41 }
 0x2cb   :  { %358 = vrot.lane.b32.xlu1 %v350_v55, %s5395_s19  ;;  %v695_v45 = vsel %vm168_vm4, %v694_v42, %v693_v43 }
 0x2cc   :  { %v697_v47 = vsel %vm171_vm5, %v696_v44, %v695_v45 }
 0x33d   :  { %v359_v16 = vpop.permute.xlu1 %358 }
 0x33e   :  { %4415 = vmatmul.mubr.msk.f32.vlgmr.msra.gmra.mrb[0].mxu1 %vm252_vm9, %v359_v16 }
 0x33f   :  { %4813 = vmatpush3.bf16.msra.mxu1 %v5567_v5  ;;  %4421 = vmatprep.mubr.msk.f32.mxu1 %vm5392_vm0, %v5393_v1 }
 0x340   :  { %4814 = vmatprep.subr.bf16.mxu1 %v5391_v0 }
 0x342   :  { %4422 = vmatmul.mubr.msk.f32.vlgmr.msra.gmra.mrb[2].mxu1 %vm179_vm8, %v445_v17  ;;  %v944_v17 = vrot.slane %v5565_v4, 3 }
 0x343   :  { %4816 = vmatpush3.bf16.msra.mxu1 %v5598_v27  ;;  %4432 = vmatprep.mubr.msk.f32.mxu1 %vm5392_vm0, %v5393_v1 }
 0x344   :  { %4817 = vmatprep.subr.bf16.mxu1 %v5391_v0 }
 0x347   :  { %4819 = vmatpush3.bf16.msra.mxu1 %v5604_v32 }
 0x348   :  { %4835 = vmatprep.subr.bf16.mxu1 %v5391_v0 }
 0x34a   :  { %4433 = vmatmul.mubr.msk.f32.vlgmr.msra.gmra.mrb[2].mxu1 %vm252_vm9, %v359_v16 }
 0x34b   :  { %4837 = vmatpush3.bf16.msra.mxu1 %v5625_v50  ;;  %4472 = vmatprep.mubr.msk.f32.mxu1 %vm5392_vm0, %v5393_v1 }
 0x34c   :  { %4838 = vmatprep.subr.bf16.mxu1 %v5391_v0 }
 0x34f   :  { %4840 = vmatpush3.bf16.msra.mxu1 %v5628_v52 }
 0x350   :  { %4841 = vmatprep.subr.bf16.mxu1 %v5391_v0 }
 0x41d   :  { %v584_v18 = vpop.f32.mrb[2].mxu1 }
 0x41e   :  { %v5014_v19 = vadd.f32 %v5617_v33, %v584_v18  ;;  %v4434_v20 = vpop.f32.mrb[3].mxu1  ;;  %v945_v18 = vrot.slane %v5569_v6, 2 }
 0x420   :  { %5083 = vtanh.f32 %v5014_v19  ;;  %v4154_v22 = vmul.f32 -1.442695, %v5014_v19  ;;  %v947_v19 = vrot.slane %v5571_v7, 1  ;;  %v946_v20 = vsel %vm159_vm1, %v945_v18, %v944_v17 }
 0x422   :  { %5085 = vpow2.f32 %v4154_v22  ;;  %v950_v22 = vrot.slane %v5575_v9, 7 }
 0x42a   :  { %v5084_v21 = vpop.eup %5083 }
 0x42b   :  { %598 = vrot.lane.b32.xlu0 %v5084_v21, %s5394_s18  ;;  %v948_v21 = vsel %vm162_vm2, %v947_v19, %v946_v20 }
 0x42c   :  { %v5086_v23 = vpop.eup %5085 }
 0x42d   :  { %v592_v24 = vadd.f32 1.0, %v5086_v23  ;;  %v949_v23 = vsel %vm165_vm3, %v5573_v8, %v948_v21 }
 0x42f   :  { %5087 = vrcp.f32 %v592_v24  ;;  %v952_v24 = vrot.slane %v5577_v10, 6 }
 0x439   :  { %v5088_v25 = vpop.eup %5087 }
 0x43a   :  { %v596_v29 = vmul.f32 %v5088_v25, %v5622_v46  ;;  %v698_v46 = vrot.slane %v5579_v11, 4 }
 0x43c   :  { %v699_v49 = vsel %vm174_vm6, %v698_v46, %v697_v47 }
 0x43d   :  { %v701_v53 = vsel %vm177_vm7, %v700_v48, %v699_v49 }
 0x49d   :  { %v599_v26 = vpop.permute.xlu0 %598 }
 0x49e   :  { %v601_v28 = vmul.f32 %v5088_v25, %v599_v26  ;;  %v954_v26 = vrot.slane %v5579_v11, 5 }
 0x4a0   :  { %603 = vrot.lane.b32.xlu1 %v601_v28, %s5395_s19 }
 0x512   :  { %v604_v30 = vpop.permute.xlu1 %603 }
 0x513   :  { %v606_v31 = vadd.f32 %v604_v30, %v596_v29  ;;  %v956_v29 = vrot.slane %v5585_v15, 4 }
 0x515   :  { %5089 = vtanh.f32 %v606_v31 }
 0x51f   :  { %v5090_v34 = vpop.eup %5089 }
 0x520   :  { %609 = vrot.lane.b32.xlu0 %v5090_v34, %s5394_s18 }
 0x592   :  { %v610_v35 = vpop.permute.xlu0 %609 }
 0x593   :  { %v612_v36 = vmul.f32 %v5088_v25, %v610_v35  ;;  %v951_v25 = vsel %vm168_vm4, %v950_v22, %v949_v23 }
 0x594   :  { %v953_v28 = vsel %vm171_vm5, %v952_v24, %v951_v25 }
 0x595   :  { %614 = vrot.lane.b32.xlu1 %v612_v36, %s5395_s19  ;;  %v955_v30 = vsel %vm174_vm6, %v954_v26, %v953_v28 }
 0x596   :  { %v957_v34 = vsel %vm177_vm7, %v956_v29, %v955_v30 }
 0x607   :  { %v615_v51 = vpop.permute.xlu1 %614 }
 0x608   :  { %4444 = vmatmul.mubr.msk.f32.vlgmr.msra.gmra.mrb[2].mxu0 %vm252_vm9, %v615_v51 }
 0x609   :  { %4828 = vmatpush3.bf16.msra.mxu0 %v5567_v5  ;;  %4450 = vmatprep.mubr.msk.f32.mxu0 %vm5392_vm0, %v5393_v1 }
 0x60a   :  { %4829 = vmatprep.subr.bf16.mxu0 %v5391_v0 }
 0x60c   :  { %4451 = vmatmul.mubr.msk.f32.vlgmr.msra.gmra.mrb[4].mxu0 %vm179_vm8, %v701_v53  ;;  %v1200_v53 = vrot.slane %v5565_v4, 4 }
 0x60d   :  { %4831 = vmatpush3.bf16.msra.mxu0 %v5598_v27  ;;  %4461 = vmatprep.mubr.msk.f32.mxu0 %vm5392_vm0, %v5393_v1 }
 0x60e   :  { %4832 = vmatprep.subr.bf16.mxu0 %v5391_v0 }
 0x611   :  { %4834 = vmatpush3.bf16.msra.mxu0 %v5604_v32 }
 0x612   :  { %4850 = vmatprep.subr.bf16.mxu0 %v5391_v0 }
 0x614   :  { %4462 = vmatmul.mubr.msk.f32.vlgmr.msra.gmra.mrb[4].mxu0 %vm252_vm9, %v615_v51 }
 0x615   :  { %4852 = vmatpush3.bf16.msra.mxu0 %v5625_v50  ;;  %4501 = vmatprep.mubr.msk.f32.mxu0 %vm5392_vm0, %v5393_v1 }
 0x616   :  { %4853 = vmatprep.subr.bf16.mxu0 %v5391_v0 }
 0x619   :  { %4855 = vmatpush3.bf16.msra.mxu0 %v5628_v52 }
 0x61a   :  { %4856 = vmatprep.subr.bf16.mxu0 %v5391_v0 }
 0x6e7   :  { %v840_v54 = vpop.f32.mrb[4].mxu0 }
 0x6e8   :  { %v5016_v55 = vadd.f32 %v5617_v33, %v840_v54  ;;  %v4463_v56 = vpop.f32.mrb[5].mxu0  ;;  %v1201_v54 = vrot.slane %v5569_v6, 3 }
 0x6ea   :  { %5091 = vtanh.f32 %v5016_v55  ;;  %v4158_v58 = vmul.f32 -1.442695, %v5016_v55  ;;  %v1203_v55 = vrot.slane %v5571_v7, 2  ;;  %v1202_v56 = vsel %vm159_vm1, %v1201_v54, %v1200_v53 }
 0x6ec   :  { %5093 = vpow2.f32 %v4158_v58  ;;  %v1204_v58 = vsel %vm162_vm2, %v1203_v55, %v1202_v56 }
 0x6f4   :  { %v5092_v57 = vpop.eup %5091 }
 0x6f5   :  { %854 = vrot.lane.b32.xlu0 %v5092_v57, %s5394_s18  ;;  %v1205_v57 = vrot.slane %v5573_v8, 1 }
 0x6f6   :  { %v5094_v59 = vpop.eup %5093 }
 0x6f7   :  { %v848_v60 = vadd.f32 1.0, %v5094_v59  ;;  %v1206_v59 = vsel %vm165_vm3, %v1205_v57, %v1204_v58 }
 0x6f9   :  { %5095 = vrcp.f32 %v848_v60  ;;  %v1208_v60 = vrot.slane %v5577_v10, 7 }
 0x703   :  { %v5096_v61 = vpop.eup %5095 }
 0x704   :  { %v852_v2 = vmul.f32 %v5096_v61, %v606_v31 }
 0x767   :  { %v855_v62 = vpop.permute.xlu0 %854 }
 0x768   :  { %v857_v63 = vmul.f32 %v5096_v61, %v855_v62  ;;  %v1210_v62 = vrot.slane %v5579_v11, 6 }
 0x76a   :  { %859 = vrot.lane.b32.xlu1 %v857_v63, %s5395_s19 }
 0x7dc   :  { %v860_v3 = vpop.permute.xlu1 %859 }
 0x7dd   :  { %v862_v12 = vadd.f32 %v860_v3, %v852_v2  ;;  %v1212_v2 = vrot.slane %v5585_v15, 5 }
 0x7df   :  { %5097 = vtanh.f32 %v862_v12 }
 0x7e9   :  { %v5098_v13 = vpop.eup %5097 }
 0x7ea   :  { %865 = vrot.lane.b32.xlu0 %v5098_v13, %s5394_s18 }
 0x85c   :  { %v866_v14 = vpop.permute.xlu0 %865 }
 0x85d   :  { %v868_v16 = vmul.f32 %v5096_v61, %v866_v14  ;;  %v1207_v61 = vsel %vm168_vm4, %v5575_v9, %v1206_v59 }
 0x85e   :  { %v1209_v63 = vsel %vm171_vm5, %v1208_v60, %v1207_v61 }
 0x85f   :  { %870 = vrot.lane.b32.xlu1 %v868_v16, %s5395_s19  ;;  %v1211_v3 = vsel %vm174_vm6, %v1210_v62, %v1209_v63 }
 0x860   :  { %v1213_v13 = vsel %vm177_vm7, %v1212_v2, %v1211_v3 }
 0x8d1   :  { %v871_v31 = vpop.permute.xlu1 %870 }
 0x8d2   :  { %4473 = vmatmul.mubr.msk.f32.vlgmr.msra.gmra.mrb[4].mxu1 %vm252_vm9, %v871_v31 }
 0x8d3   :  { %4843 = vmatpush3.bf16.msra.mxu1 %v5567_v5  ;;  %4479 = vmatprep.mubr.msk.f32.mxu1 %vm5392_vm0, %v5393_v1 }
 0x8d4   :  { %4844 = vmatprep.subr.bf16.mxu1 %v5391_v0 }
 0x8d6   :  { %4480 = vmatmul.mubr.msk.f32.vlgmr.msra.gmra.mrb[6].mxu1 %vm179_vm8, %v957_v34  ;;  %v1456_v34 = vrot.slane %v5565_v4, 5 }
 0x8d7   :  { %4846 = vmatpush3.bf16.msra.mxu1 %v5598_v27  ;;  %4490 = vmatprep.mubr.msk.f32.mxu1 %vm5392_vm0, %v5393_v1 }
 0x8d8   :  { %4847 = vmatprep.subr.bf16.mxu1 %v5391_v0 }
 0x8db   :  { %4849 = vmatpush3.bf16.msra.mxu1 %v5604_v32 }
 0x8dc   :  { %4865 = vmatprep.subr.bf16.mxu1 %v5391_v0 }
 0x8de   :  { %4491 = vmatmul.mubr.msk.f32.vlgmr.msra.gmra.mrb[6].mxu1 %vm252_vm9, %v871_v31 }
 0x8df   :  { %4867 = vmatpush3.bf16.msra.mxu1 %v5625_v50  ;;  %4530 = vmatprep.mubr.msk.f32.mxu1 %vm5392_vm0, %v5393_v1 }
 0x8e0   :  { %4868 = vmatprep.subr.bf16.mxu1 %v5391_v0 }
 0x8e3   :  { %4870 = vmatpush3.bf16.msra.mxu1 %v5628_v52 }
 0x8e4   :  { %4871 = vmatprep.subr.bf16.mxu1 %v5391_v0 }
 0x9b1   :  { %v1096_v35 = vpop.f32.mrb[6].mxu1 }
 0x9b2   :  { %v5018_v36 = vadd.f32 %v5617_v33, %v1096_v35  ;;  %v4492_v37 = vpop.f32.mrb[7].mxu1  ;;  %v1457_v35 = vrot.slane %v5569_v6, 4 }
 0x9b4   :  { %5099 = vtanh.f32 %v5018_v36  ;;  %v4162_v39 = vmul.f32 -1.442695, %v5018_v36  ;;  %v1459_v36 = vrot.slane %v5571_v7, 3  ;;  %v1458_v37 = vsel %vm159_vm1, %v1457_v35, %v1456_v34 }
 0x9b6   :  { %5101 = vpow2.f32 %v4162_v39  ;;  %v1460_v39 = vsel %vm162_vm2, %v1459_v36, %v1458_v37 }
 0x9be   :  { %v5100_v38 = vpop.eup %5099 }
 0x9bf   :  { %1110 = vrot.lane.b32.xlu0 %v5100_v38, %s5394_s18  ;;  %v1461_v38 = vrot.slane %v5573_v8, 2 }
 0x9c0   :  { %v5102_v40 = vpop.eup %5101 }
 0x9c1   :  { %v1104_v41 = vadd.f32 1.0, %v5102_v40  ;;  %v1463_v40 = vrot.slane %v5575_v9, 1 }
 0x9c3   :  { %5103 = vrcp.f32 %v1104_v41  ;;  %v1462_v41 = vsel %vm165_vm3, %v1461_v38, %v1460_v39 }
 0x9cd   :  { %v5104_v42 = vpop.eup %5103 }
 0x9ce   :  { %v1108_v45 = vmul.f32 %v5104_v42, %v862_v12 }
 0xa31   :  { %v1111_v43 = vpop.permute.xlu0 %1110 }
 0xa32   :  { %v1113_v44 = vmul.f32 %v5104_v42, %v1111_v43  ;;  %v1466_v43 = vrot.slane %v5579_v11, 7 }
 0xa34   :  { %1115 = vrot.lane.b32.xlu1 %v1113_v44, %s5395_s19 }
 0xaa6   :  { %v1116_v46 = vpop.permute.xlu1 %1115 }
 0xaa7   :  { %v1118_v47 = vadd.f32 %v1116_v46, %v1108_v45  ;;  %v1468_v45 = vrot.slane %v5585_v15, 6 }
 0xaa9   :  { %5105 = vtanh.f32 %v1118_v47 }
 0xab3   :  { %v5106_v48 = vpop.eup %5105 }
 0xab4   :  { %1121 = vrot.lane.b32.xlu0 %v5106_v48, %s5394_s18 }
 0xb26   :  { %v1122_v49 = vpop.permute.xlu0 %1121 }
 0xb27   :  { %v1124_v51 = vmul.f32 %v5104_v42, %v1122_v49  ;;  %v1464_v42 = vsel %vm168_vm4, %v1463_v40, %v1462_v41 }
 0xb28   :  { %v1465_v44 = vsel %vm171_vm5, %v5577_v10, %v1464_v42 }
 0xb29   :  { %1126 = vrot.lane.b32.xlu1 %v1124_v51, %s5395_s19  ;;  %v1467_v46 = vsel %vm174_vm6, %v1466_v43, %v1465_v44 }
 0xb2a   :  { %v1469_v48 = vsel %vm177_vm7, %v1468_v45, %v1467_v46  ;;  %v1968_v46 = vrot.slane %v5565_v4, 7 }
 0xb9b   :  { %v1127_v12 = vpop.permute.xlu1 %1126 }
 0xb9c   :  { %4502 = vmatmul.mubr.msk.f32.vlgmr.msra.gmra.mrb[6].mxu0 %vm252_vm9, %v1127_v12 }
 0xb9d   :  { %4858 = vmatpush3.bf16.msra.mxu0 %v5567_v5  ;;  %4508 = vmatprep.mubr.msk.f32.mxu0 %vm5392_vm0, %v5393_v1 }
 0xb9e   :  { %4859 = vmatprep.subr.bf16.mxu0 %v5391_v0 }
 0xba0   :  { %4509 = vmatmul.mubr.msk.f32.vlgmr.msra.gmra.mrb[8].mxu0 %vm179_vm8, %v1213_v13  ;;  %v1712_v13 = vrot.slane %v5565_v4, 6  ;;  %v1979_v4 = vrot.slane %v5579_v11, 1 }
 0xba1   :  { %4861 = vmatpush3.bf16.msra.mxu0 %v5598_v27  ;;  %4519 = vmatprep.mubr.msk.f32.mxu0 %vm5392_vm0, %v5393_v1 }
 0xba2   :  { %4862 = vmatprep.subr.bf16.mxu0 %v5391_v0 }
 0xba5   :  { %4864 = vmatpush3.bf16.msra.mxu0 %v5604_v32 }
 0xba6   :  { %4880 = vmatprep.subr.bf16.mxu0 %v5391_v0 }
 0xba8   :  { %4520 = vmatmul.mubr.msk.f32.vlgmr.msra.gmra.mrb[8].mxu0 %vm252_vm9, %v1127_v12 }
 0xba9   :  { %4882 = vmatpush3.bf16.msra.mxu0 %v5625_v50  ;;  %4559 = vmatprep.mubr.msk.f32.mxu0 %vm5392_vm0, %v5393_v1 }
 0xbaa   :  { %4883 = vmatprep.subr.bf16.mxu0 %v5391_v0 }
 0xbad   :  { %4885 = vmatpush3.bf16.msra.mxu0 %v5628_v52 }
 0xbae   :  { %4886 = vmatprep.subr.bf16.mxu0 %v5391_v0 }
 0xc7b   :  { %v1352_v14 = vpop.f32.mrb[8].mxu0 }
 0xc7c   :  { %v5020_v16 = vadd.f32 %v5617_v33, %v1352_v14  ;;  %v4521_v17 = vpop.f32.mrb[9].mxu0  ;;  %v1713_v14 = vrot.slane %v5569_v6, 5 }
 0xc7e   :  { %5107 = vtanh.f32 %v5020_v16  ;;  %v4166_v19 = vmul.f32 -1.442695, %v5020_v16  ;;  %v1715_v16 = vrot.slane %v5571_v7, 4  ;;  %v1714_v17 = vsel %vm159_vm1, %v1713_v14, %v1712_v13 }
 0xc80   :  { %5109 = vpow2.f32 %v4166_v19  ;;  %v1716_v19 = vsel %vm162_vm2, %v1715_v16, %v1714_v17 }
 0xc88   :  { %v5108_v18 = vpop.eup %5107 }
 0xc89   :  { %1366 = vrot.lane.b32.xlu0 %v5108_v18, %s5394_s18  ;;  %v1717_v18 = vrot.slane %v5573_v8, 3 }
 0xc8a   :  { %v5110_v20 = vpop.eup %5109 }
 0xc8b   :  { %v1360_v21 = vadd.f32 1.0, %v5110_v20  ;;  %v1719_v20 = vrot.slane %v5575_v9, 2 }
 0xc8d   :  { %5111 = vrcp.f32 %v1360_v21  ;;  %v1718_v21 = vsel %vm165_vm3, %v1717_v18, %v1716_v19 }
 0xc97   :  { %v5112_v22 = vpop.eup %5111 }
 0xc98   :  { %v1364_v25 = vmul.f32 %v5112_v22, %v1118_v47 }
 0xcfb   :  { %v1367_v23 = vpop.permute.xlu0 %1366 }
 0xcfc   :  { %v1369_v24 = vmul.f32 %v5112_v22, %v1367_v23  ;;  %v1720_v23 = vsel %vm168_vm4, %v1719_v20, %v1718_v21 }
 0xcfe   :  { %1371 = vrot.lane.b32.xlu1 %v1369_v24, %s5395_s19 }
 0xd70   :  { %v1372_v26 = vpop.permute.xlu1 %1371 }
 0xd71   :  { %v1374_v28 = vadd.f32 %v1372_v26, %v1364_v25  ;;  %v1724_v25 = vrot.slane %v5585_v15, 7 }
 0xd73   :  { %5113 = vtanh.f32 %v1374_v28 }
 0xd7d   :  { %v5114_v29 = vpop.eup %5113 }
 0xd7e   :  { %1377 = vrot.lane.b32.xlu0 %v5114_v29, %s5394_s18 }
 0xdf0   :  { %v1378_v30 = vpop.permute.xlu0 %1377 }
 0xdf1   :  { %v1380_v31 = vmul.f32 %v5112_v22, %v1378_v30  ;;  %v1721_v22 = vrot.slane %v5577_v10, 1 }
 0xdf3   :  { %1382 = vrot.lane.b32.xlu1 %v1380_v31, %s5395_s19  ;;  %v1722_v24 = vsel %vm171_vm5, %v1721_v22, %v1720_v23 }
 0xdf4   :  { %v1723_v26 = vsel %vm174_vm6, %v5579_v11, %v1722_v24  ;;  %v127_v11 = vld [vmem:[#allocation10 + $0x10] sm:$0xff] }
 0xdf5   :  { %v1725_v29 = vsel %vm177_vm7, %v1724_v25, %v1723_v26 }
 0xe65   :  { %v1383_v47 = vpop.permute.xlu1 %1382 }
 0xe66   :  { %4531 = vmatmul.mubr.msk.f32.vlgmr.msra.gmra.mrb[8].mxu1 %vm252_vm9, %v1383_v47 }
 0xe67   :  { %4873 = vmatpush3.bf16.msra.mxu1 %v5567_v5  ;;  %4537 = vmatprep.mubr.msk.f32.mxu1 %vm5392_vm0, %v5393_v1 }
 0xe68   :  { %4874 = vmatprep.subr.bf16.mxu1 %v5391_v0 }
 0xe6a   :  { %4538 = vmatmul.mubr.msk.f32.vlgmr.msra.gmra.mrb[10].mxu1 %vm179_vm8, %v1469_v48  ;;  %v1971_v48 = vrot.slane %v5571_v7, 5 }
 0xe6b   :  { %4876 = vmatpush3.bf16.msra.mxu1 %v5598_v27  ;;  %4548 = vmatprep.mubr.msk.f32.mxu1 %vm5392_vm0, %v5393_v1 }
 0xe6c   :  { %4877 = vmatprep.subr.bf16.mxu1 %v5391_v0 }
 0xe6f   :  { %4879 = vmatpush3.bf16.msra.mxu1 %v5604_v32 }
 0xe70   :  { %4895 = vmatprep.subr.bf16.mxu1 %v5391_v0 }
 0xe72   :  { %4549 = vmatmul.mubr.msk.f32.vlgmr.msra.gmra.mrb[10].mxu1 %vm252_vm9, %v1383_v47  ;;  %v1969_v47 = vrot.slane %v5569_v6, 6 }
 0xe73   :  { %4897 = vmatpush3.bf16.msra.mxu1 %v5625_v50  ;;  %4588 = vmatprep.mubr.msk.f32.mxu1 %vm5392_vm0, %v5393_v1 }
 0xe74   :  { %4898 = vmatprep.subr.bf16.mxu1 %v5391_v0 }
 0xe77   :  { %4900 = vmatpush3.bf16.msra.mxu1 %v5628_v52 }
 0xe78   :  { %4901 = vmatprep.subr.bf16.mxu1 %v5391_v0 }
 0xf45   :  { %v1608_v49 = vpop.f32.mrb[10].mxu1 }
 0xf46   :  { %v5022_v51 = vadd.f32 %v5617_v33, %v1608_v49  ;;  %v4550_v53 = vpop.f32.mrb[11].mxu1  ;;  %v1970_v49 = vsel %vm159_vm1, %v1969_v47, %v1968_v46  ;;  %v5969_v46 = vld [vmem:[%s6229_s8] ss:$0 sm:$0xff]  ;;  %s5397_s8 = smov [#allocation13]  }
 0xf47   :  { %v1972_v53 = vsel %vm162_vm2, %v1971_v48, %v1970_v49  ;;  %s4132_s24 = sshll.u32 %s5397_s8, 4  ;;  %s4133_s24 = int_to_ptr.vmem [resolvable:$true] %s4132_s24 }
 0xf48   :  { %5115 = vtanh.f32 %v5022_v51  ;;  %v4170_v55 = vmul.f32 -1.442695, %v5022_v51  ;;  %v1973_v51 = vrot.slane %v5573_v8, 4  ;;  %s5351_s25 = scalar_lea.vmem %s4133_s24, 1024  ;;  %p5356_p7 = scmp.lt.s32.totalorder %s4133_s24, %s4133_s24 }
 0xf49   :  { %p5352_p6 = scmp.ne.s32.totalorder %s4133_s24, %s5351_s25  ;;  %p5357_p8 = scmp.lt.s32.totalorder %s5351_s25, %s5351_s25 }
 0xf4a   :  { %5117 = vpow2.f32 %v4170_v55  ;;  %v1974_v55 = vsel %vm165_vm3, %v1973_v51, %v1972_v53  ;;  %v5396_v51 = vmov 1966171168  }
 0xf4b   :  { %v2404_v53 = vunpack.c.l.s4 %v5396_v51  ;;  %p5358_p9 = por %p5357_p8, %p5356_p7 }
 0xf4d   :  { %p5359_p10 = pnand %p5358_p9, %p5352_p6 }
 0xf52   :  { %v5116_v54 = vpop.eup %5115 }
 0xf53   :  { %1622 = vrot.lane.b32.xlu0 %v5116_v54, %s5394_s18  ;;  %v1975_v54 = vrot.slane %v5575_v9, 3  ;;  %v125_v9 = vld [vmem:[#allocation10] sm:$0xff] }
 0xf54   :  { %v5118_v56 = vpop.eup %5117 }
 0xf55   :  { %v1616_v57 = vadd.f32 1.0, %v5118_v56  ;;  %v1977_v56 = vrot.slane %v5577_v10, 2  ;;  %v126_v10 = vld [vmem:[#allocation10 + $0x8] sm:$0xff] }
 0xf57   :  { %5119 = vrcp.f32 %v1616_v57  ;;  %v1976_v57 = vsel %vm168_vm4, %v1975_v54, %v1974_v55  ;;  %v2406_v54 = vlaneseq  ;;  %v2405_v55 = vunpack.c.0.s8 %v2404_v53 }
 0xf58   :  { %v1978_v6 = vsel %vm171_vm5, %v1977_v56, %v1976_v57 }
 0xf59   :  { %v1980_v7 = vsel %vm174_vm6, %v1979_v4, %v1978_v6  ;;  %v2407_v56 = vshrl.u32 %v2406_v54, 7 }
 0xf5a   :  { %v1981_v8 = vsel %vm177_vm7, %v5585_v15, %v1980_v7  ;;  %v128_v15 = vld [vmem:[#allocation10 + $0x18] sm:$0xff] }
 0xf5b   :  { %v5973_v7 = vsub.s32 %v2405_v55, %v2407_v56 }
 0xf61   :  { %v5120_v58 = vpop.eup %5119 }
 0xf62   :  { %v1620_v61 = vmul.f32 %v5120_v58, %v1374_v28 }
 0xfc5   :  { %v1623_v59 = vpop.permute.xlu0 %1622 }
 0xfc6   :  { %v1625_v60 = vmul.f32 %v5120_v58, %v1623_v59 }
 0xfc8   :  { %1627 = vrot.lane.b32.xlu1 %v1625_v60, %s5395_s19 }
0x103a   :  { %v1628_v62 = vpop.permute.xlu1 %1627 }
0x103b   :  { %v1630_v63 = vadd.f32 %v1628_v62, %v1620_v61  ;;  %v5922_v61 = vld [vmem:[%s6227_s6] ss:$0 sm:$0xff] }
0x103d   :  { %5121 = vtanh.f32 %v1630_v63 }
0x1047   :  { %v5122_v2 = vpop.eup %5121 }
0x1048   :  { %1633 = vrot.lane.b32.xlu0 %v5122_v2, %s5394_s18 }
0x10ba   :  { %v1634_v3 = vpop.permute.xlu0 %1633 }
0x10bb   :  { %v1636_v12 = vmul.f32 %v5120_v58, %v1634_v3 }
0x10bd   :  { %1638 = vrot.lane.b32.xlu1 %v1636_v12, %s5395_s19 }
0x112f   :  { %v1639_v28 = vpop.permute.xlu1 %1638 }
0x1130   :  { %4560 = vmatmul.mubr.msk.f32.vlgmr.msra.gmra.mrb[10].mxu0 %vm252_vm9, %v1639_v28 }
0x1131   :  { %4888 = vmatpush3.bf16.msra.mxu0 %v5567_v5  ;;  %4566 = vmatprep.mubr.msk.f32.mxu0 %vm5392_vm0, %v5393_v1 }
0x1132   :  { %4889 = vmatprep.subr.bf16.mxu0 %v5391_v0 }
0x1134   :  { %4567 = vmatmul.mubr.msk.f32.vlgmr.msra.gmra.mrb[12].mxu0 %vm179_vm8, %v1725_v29 }
0x1135   :  { %4891 = vmatpush3.bf16.msra.mxu0 %v5598_v27  ;;  %4577 = vmatprep.mubr.msk.f32.mxu0 %vm5392_vm0, %v5393_v1 }
0x1136   :  { %4892 = vmatprep.subr.bf16.mxu0 %v5391_v0 }
0x1139   :  { %4894 = vmatpush3.bf16.msra.mxu0 %v5604_v32 }
0x113a   :  { %4910 = vmatprep.subr.bf16.mxu0 %v5391_v0 }
0x113c   :  { %4578 = vmatmul.mubr.msk.f32.vlgmr.msra.gmra.mrb[12].mxu0 %vm252_vm9, %v1639_v28 }
0x113d   :  { %4912 = vmatpush3.bf16.msra.mxu0 %v5625_v50  ;;  %4617 = vmatprep.mubr.msk.f32.mxu0 %vm5392_vm0, %v5393_v1 }
0x113e   :  { %4913 = vmatprep.subr.bf16.mxu0 %v5391_v0 }
0x1141   :  { %4915 = vmatpush3.bf16.msra.mxu0 %v5628_v52 }
0x1142   :  { %4922 = vmatprep.subr.bf16.mxu0 %v5391_v0 }
0x120f   :  { %v1864_v30 = vpop.f32.mrb[12].mxu0 }
0x1210   :  { %v5024_v31 = vadd.f32 %v5617_v33, %v1864_v30  ;;  %v4579_v34 = vpop.f32.mrb[13].mxu0 }
0x1212   :  { %5123 = vtanh.f32 %v5024_v31  ;;  %v4174_v36 = vmul.f32 -1.442695, %v5024_v31 }
0x1214   :  { %5125 = vpow2.f32 %v4174_v36  ;;  %v131_v36 = vld [vmem:[#allocation11] sm:$0xff] }
0x121c   :  { %v5124_v35 = vpop.eup %5123 }
0x121d   :  { %1878 = vrot.lane.b32.xlu0 %v5124_v35, %s5394_s18 }
0x121e   :  { %v5126_v50 = vpop.eup %5125 }
0x121f   :  { %v1872_v37 = vadd.f32 1.0, %v5126_v50  ;;  %v132_v50 = vld [vmem:[#allocation11 + $0x8] sm:$0xff] }
0x1221   :  { %5127 = vrcp.f32 %v1872_v37  ;;  %v5935_v37 = vpack.c.bf16 %v132_v50, %v131_v36 }
0x122b   :  { %v5128_v38 = vpop.eup %5127 }
0x122c   :  { %v1876_v52 = vmul.f32 %v5128_v38, %v1630_v63 }
0x128f   :  { %v1879_v39 = vpop.permute.xlu0 %1878 }
0x1290   :  { %v1881_v40 = vmul.f32 %v5128_v38, %v1879_v39  ;;  %v134_v39 = vld [vmem:[#allocation11 + $0x18] sm:$0xff] }
0x1292   :  { %1883 = vrot.lane.b32.xlu1 %v1881_v40, %s5395_s19 }
0x1304   :  { %v1884_v41 = vpop.permute.xlu1 %1883 }
0x1305   :  { %v5872_v42 = vadd.f32 %v1884_v41, %v1876_v52 }
0x1307   :  { %5129 = vtanh.f32 %v5872_v42 }
0x1311   :  { %v5130_v43 = vpop.eup %5129 }
0x1312   :  { %1889 = vrot.lane.b32.xlu0 %v5130_v43, %s5394_s18 }
0x1384   :  { %v1890_v44 = vpop.permute.xlu0 %1889 }
0x1385   :  { %v1892_v45 = vmul.f32 %v5128_v38, %v1890_v44  ;;  %v133_v38 = vld [vmem:[#allocation11 + $0x10] sm:$0xff] }
0x1386   :  { %v5939_v40 = vpack.c.bf16 %v134_v39, %v133_v38 }
0x1387   :  { %1894 = vrot.lane.b32.xlu1 %v1892_v45, %s5395_s19 }
0x13f9   :  { %v1895_v58 = vpop.permute.xlu1 %1894 }
0x13fa   :  { %4589 = vmatmul.mubr.msk.f32.vlgmr.msra.gmra.mrb[12].mxu1 %vm252_vm9, %v1895_v58 }
0x13fb   :  { %4903 = vmatpush3.bf16.msra.mxu1 %v5567_v5  ;;  %4595 = vmatprep.mubr.msk.f32.mxu1 %vm5392_vm0, %v5393_v1  ;;  %v5903_v5 = vpack.c.bf16 %v126_v10, %v125_v9 }
0x13fc   :  { %4904 = vmatprep.subr.bf16.mxu1 %v5391_v0 }
0x13fe   :  { %4596 = vmatmul.mubr.msk.f32.vlgmr.msra.gmra.mrb[14].mxu1 %vm179_vm8, %v1981_v8 }
0x13ff   :  { %4906 = vmatpush3.bf16.msra.mxu1 %v5598_v27  ;;  %4606 = vmatprep.mubr.msk.f32.mxu1 %vm5392_vm0, %v5393_v1  ;;  %v5908_v27 = vpack.c.bf16 %v128_v15, %v127_v11 }
0x1400   :  { %4907 = vmatprep.subr.bf16.mxu1 %v5391_v0 }
0x1403   :  { %4909 = vmatpush3.bf16.msra.mxu1 %v5604_v32 }
0x1404   :  { %4916 = vmatprep.subr.bf16.mxu1 %v5391_v0 }
0x1406   :  { %4607 = vmatmul.mubr.msk.f32.vlgmr.msra.gmra.mrb[14].mxu1 %vm252_vm9, %v1895_v58 }
0x1407   :  { %4918 = vmatpush3.bf16.msra.mxu1 %v5903_v5  ;;  %4628 = vmatprep.mubr.msk.f32.mxu1 %vm5392_vm0, %v5393_v1 }
0x1408   :  { %4919 = vmatprep.subr.bf16.mxu1 %v5391_v0 }
0x140b   :  { %4921 = vmatpush3.bf16.msra.mxu1 %v5908_v27 }
0x140c   :  { %4934 = vmatprep.subr.bf16.mxu1 %v5391_v0 }
0x140e   :  { %4629 = vmatmul.mubr.f32.vlgmr.msra.gmra.mrb[0].mxu1 %v5393_v1 }
0x140f   :  { %4661 = vmatprep.mubr.msk.f32.mxu1 %vm5392_vm0, %v5393_v1  ;;  %4936 = vmatpush3.bf16.msra.mxu1 %v5935_v37 }
0x1410   :  { %4937 = vmatprep.subr.bf16.mxu1 %v5391_v0 }
0x1413   :  { %4939 = vmatpush3.bf16.msra.mxu1 %v5939_v40 }
0x1414   :  { %4940 = vmatprep.subr.bf16.mxu1 %v5391_v0 }
0x14d9   :  { %v2120_v32 = vpop.f32.mrb[14].mxu1 }
0x14da   :  { %v5026_v59 = vadd.f32 %v5617_v33, %v2120_v32  ;;  %v4608_v60 = vpop.f32.mrb[15].mxu1 }
0x14dc   :  { %5131 = vtanh.f32 %v5026_v59  ;;  %v4178_v13 = vmul.f32 -1.442695, %v5026_v59 }
0x14e1   :  { %v2290_v62 = vpop.f32.mrb[0].mxu1 }
0x14e2   :  { %v5013_v63 = vadd.f32 %v5922_v61, %v2290_v62  ;;  %v4630_v2 = vpop.f32.mrb[1].mxu1 }
0x14e4   :  { %5133 = vtanh.f32 %v5013_v63  ;;  %v4180_v33 = vmul.f32 -1.442695, %v5013_v63 }
0x14e5   :  { %5135 = vpow2.f32 %v4178_v13 }
0x14e6   :  { %v5132_v3 = vpop.eup %5131  ;;  %5137 = vpow2.f32 %v4180_v33 }
0x14e7   :  { %2134 = vrot.lane.b32.xlu0 %v5132_v3, %s5394_s18 }
0x14ee   :  { %v5134_v12 = vpop.eup %5133 }
0x14ef   :  { %2304 = vrot.lane.b32.xlu1 %v5134_v12, %s5394_s18  ;;  %v5136_v14 = vpop.eup %5135 }
0x14f0   :  { %v2128_v16 = vadd.f32 1.0, %v5136_v14  ;;  %v5138_v17 = vpop.eup %5137 }
0x14f1   :  { %v2298_v18 = vadd.f32 1.0, %v5138_v17 }
0x14f2   :  { %5139 = vrcp.f32 %v2128_v16 }
0x14f3   :  { %5141 = vrcp.f32 %v2298_v18 }
0x14fc   :  { %v5140_v19 = vpop.eup %5139 }
0x14fd   :  { %v5142_v22 = vpop.eup %5141  ;;  %v2132_v25 = vmul.f32 %v5140_v19, %v5872_v42 }
0x14fe   :  { %v2302_v29 = vmul.f32 0.0, %v5142_v22 }
0x1559   :  { %v2135_v20 = vpop.permute.xlu0 %2134 }
0x155a   :  { %v2137_v21 = vmul.f32 %v5140_v19, %v2135_v20 }
0x155c   :  { %2139 = vrot.lane.b32.xlu0 %v2137_v21, %s5395_s19 }
0x1561   :  { %v2305_v23 = vpop.permute.xlu1 %2304 }
0x1562   :  { %v2307_v24 = vmul.f32 %v5142_v22, %v2305_v23 }
0x1564   :  { %2309 = vrot.lane.b32.xlu1 %v2307_v24, %s5395_s19 }
0x15ce   :  { %v2140_v26 = vpop.permute.xlu0 %2139 }
0x15cf   :  { %v2142_v28 = vadd.f32 %v2140_v26, %v2132_v25 }
0x15d1   :  { %5143 = vtanh.f32 %v2142_v28 }
0x15d6   :  { %v2310_v30 = vpop.permute.xlu1 %2309 }
0x15d7   :  { %v5930_v31 = vadd.f32 %v2310_v30, %v2302_v29 }
0x15d9   :  { %5145 = vtanh.f32 %v5930_v31 }
0x15db   :  { %v5144_v34 = vpop.eup %5143 }
0x15dc   :  { %2145 = vrot.lane.b32.xlu0 %v5144_v34, %s5394_s18 }
0x15e3   :  { %v5146_v35 = vpop.eup %5145 }
0x15e4   :  { %2315 = vrot.lane.b32.xlu1 %v5146_v35, %s5394_s18 }
0x164e   :  { %v2146_v52 = vpop.permute.xlu0 %2145 }
0x164f   :  { %v2148_v41 = vmul.f32 %v5140_v19, %v2146_v52 }
0x1651   :  { %2150 = vrot.lane.b32.xlu0 %v2148_v41, %s5395_s19 }
0x1656   :  { %v2316_v42 = vpop.permute.xlu1 %2315 }
0x1657   :  { %v2318_v43 = vmul.f32 %v5142_v22, %v2316_v42 }
0x1659   :  { %2326 = vrot.lane.b32.xlu1 %v2318_v43, %s5395_s19 }
0x16c3   :  { %v2151_v44 = vpop.permute.xlu0 %2150 }
0x16c4   :  { %4618 = vmatmul.mubr.msk.f32.vlgmr.msra.gmra.mrb[14].mxu0 %vm252_vm9, %v2151_v44 }
0x16c5   :  { %4924 = vmatpush3.bf16.msra.mxu0 %v5935_v37  ;;  %4639 = vmatprep.mubr.msk.f32.mxu0 %vm5392_vm0, %v5393_v1 }
0x16c6   :  { %4925 = vmatprep.subr.bf16.mxu0 %v5391_v0 }
0x16c9   :  { %4927 = vmatpush3.bf16.msra.mxu0 %v5939_v40 }
0x16ca   :  { %4928 = vmatprep.subr.bf16.mxu0 %v5391_v0 }
0x16cb   :  { %v2327_v45 = vpop.permute.xlu1 %2326 }
0x16cc   :  { %4640 = vmatmul.mubr.msk.f32.vlgmr.msra.gmra.mrb[16].mxu0 %vm252_vm9, %v2327_v45 }
0x16cd   :  { %4930 = vmatpush3.bf16.msra.mxu0 %v5903_v5  ;;  %4650 = vmatprep.mubr.msk.f32.mxu0 %vm5392_vm0, %v5393_v1 }
0x16ce   :  { %4931 = vmatprep.subr.bf16.mxu0 %v5391_v0 }
0x16d1   :  { %4933 = vmatpush3.bf16.msra.mxu0 %v5908_v27 }
0x16d2   :  { %4946 = vmatprep.subr.bf16.mxu0 %v5391_v0 }
0x16d4   :  { %4651 = vmatmul.mubr.msk.f32.vlgmr.msra.gmra.mrb[2].mxu0 %vm252_vm9, %v2327_v45 }
0x16d5   :  { %4948 = vmatpush3.bf16.msra.mxu0 %v5935_v37  ;;  %4683 = vmatprep.mubr.msk.f32.mxu0 %vm5392_vm0, %v5393_v1 }
0x16d6   :  { %4949 = vmatprep.subr.bf16.mxu0 %v5391_v0 }
0x16d9   :  { %4951 = vmatpush3.bf16.msra.mxu0 %v5939_v40 }
0x16da   :  { %4952 = vmatprep.subr.bf16.mxu0 %v5391_v0 }
0x179f   :  { %v2396_v47 = vpop.f32.mrb[16].mxu0 }
0x17a0   :  { %v2397_v48 = vadd.f32 %v5969_v46, %v2396_v47  ;;  %v4641_v49 = vpop.f32.mrb[17].mxu0 }
0x17a2   :  { %5147 = vtanh.f32 %v2397_v48 }
0x17a7   :  { %v2534_v57 = vpop.f32.mrb[2].mxu0 }
0x17a8   :  { %v5015_v4 = vadd.f32 %v5922_v61, %v2534_v57  ;;  %v4652_v6 = vpop.f32.mrb[3].mxu0 }
0x17aa   :  { %5149 = vtanh.f32 %v5015_v4  ;;  %v4184_v33 = vmul.f32 -1.442695, %v5015_v4 }
0x17ac   :  { %v5148_v58 = vpop.eup %5147  ;;  %5151 = vpow2.f32 %v4184_v33 }
0x17ad   :  { %v2402_v8 = vcombine.high %v5148_v58, %v5148_v58  ;;  %v2409_v9 = vrot.slane %v5148_v58, %v5973_v7 }
0x17af   :  { %v2416_v10 = vrot.slane %v2402_v8, %v5973_v7  ;;  %v2417_v11 = vcombine.high %v2409_v9, %v2409_v9  ;;  %v2425_v15 = vrot.slane %v2409_v9, %v5973_v7 }
0x17b1   :  { %v2418_v32 = vcombine.high %v2416_v10, %v2416_v10  ;;  %v2432_v59 = vrot.slane %v2416_v10, %v5973_v7  ;;  %v2439_v60 = vrot.slane %v2417_v11, %v5973_v7  ;;  %v2447_v62 = vcombine.high %v2425_v15, %v2425_v15  ;;  %2460 = vst.msk [vmem:[#allocation13] sm:$0x1] %vm2459_vm10, %v2425_v15 }
0x17b3   :  { %v2446_v63 = vrot.slane %v2418_v32, %v5973_v7  ;;  %v2448_v2 = vcombine.high %v2432_v59, %v2432_v59  ;;  %v2449_v3 = vcombine.high %v2439_v60, %v2439_v60  ;;  %2461 = vst.msk [vmem:[#allocation13 + $0x8] sm:$0x1] %vm2459_vm10, %v2439_v60  ;;  %2462 = vst.msk [vmem:[#allocation13 + $0x10] sm:$0x1] %vm2459_vm10, %v2447_v62 }
0x17b4   :  { %2464 = vst.msk [vmem:[#allocation13 + $0x20] sm:$0x1] %vm2459_vm10, %v2432_v59  ;;  %v5150_v12 = vpop.eup %5149 }
0x17b5   :  { %v2450_v13 = vcombine.high %v2446_v63, %v2446_v63  ;;  %2463 = vst.msk [vmem:[#allocation13 + $0x18] sm:$0x1] %vm2459_vm10, %v2449_v3  ;;  %2465 = vst.msk [vmem:[#allocation13 + $0x28] sm:$0x1] %vm2459_vm10, %v2446_v63  ;;  %2548 = vrot.lane.b32.xlu0 %v5150_v12, %s5394_s18 }
0x17b6   :  { %2466 = vst.msk [vmem:[#allocation13 + $0x30] sm:$0x1] %vm2459_vm10, %v2448_v2  ;;  %v5152_v14 = vpop.eup %5151 }
0x17b7   :  { %2467 = vst.msk [vmem:[#allocation13 + $0x38] sm:$0x1] %vm2459_vm10, %v2450_v13  ;;  %v2542_v16 = vadd.f32 1.0, %v5152_v14 }
0x17b9   :  { %5153 = vrcp.f32 %v2542_v16 }
0x17c3   :  { %v5154_v17 = vpop.eup %5153 }
0x17c4   :  { %v2546_v20 = vmul.f32 %v5154_v17, %v5930_v31 }
0x1827   :  { %v2549_v18 = vpop.permute.xlu0 %2548 }
0x1828   :  { %v2551_v19 = vmul.f32 %v5154_v17, %v2549_v18 }
0x182a   :  { %2553 = vrot.lane.b32.xlu1 %v2551_v19, %s5395_s19 }
0x189c   :  { %v2554_v21 = vpop.permute.xlu1 %2553 }
0x189d   :  { %v2556_v22 = vadd.f32 %v2554_v21, %v2546_v20 }
0x189f   :  { %5155 = vtanh.f32 %v2556_v22 }
0x18a9   :  { %v5156_v23 = vpop.eup %5155 }
0x18aa   :  { %2559 = vrot.lane.b32.xlu0 %v5156_v23, %s5394_s18 }
0x191c   :  { %v2560_v24 = vpop.permute.xlu0 %2559 }
0x191d   :  { %v2562_v25 = vmul.f32 %v5154_v17, %v2560_v24 }
0x191f   :  { %2564 = vrot.lane.b32.xlu1 %v2562_v25, %s5395_s19 }
0x1991   :  { %v2565_v26 = vpop.permute.xlu1 %2564 }
0x1992   :  { %4662 = vmatmul.mubr.msk.f32.vlgmr.msra.gmra.mrb[16].mxu1 %vm252_vm9, %v2565_v26 }
0x1993   :  { %4942 = vmatpush3.bf16.msra.mxu1 %v5903_v5  ;;  %4672 = vmatprep.mubr.msk.f32.mxu1 %vm5392_vm0, %v5393_v1 }
0x1994   :  { %4943 = vmatprep.subr.bf16.mxu1 %v5391_v0 }
0x1997   :  { %4945 = vmatpush3.bf16.msra.mxu1 %v5908_v27 }
0x1998   :  { %4958 = vmatprep.subr.bf16.mxu1 %v5391_v0 }
0x199a   :  { %4673 = vmatmul.mubr.msk.f32.vlgmr.msra.gmra.mrb[4].mxu1 %vm252_vm9, %v2565_v26 }
0x199b   :  { %4960 = vmatpush3.bf16.msra.mxu1 %v5935_v37  ;;  %4705 = vmatprep.mubr.msk.f32.mxu1 %vm5392_vm0, %v5393_v1 }
0x199c   :  { %4961 = vmatprep.subr.bf16.mxu1 %v5391_v0 }
0x199f   :  { %4963 = vmatpush3.bf16.msra.mxu1 %v5939_v40 }
0x19a0   :  { %4964 = vmatprep.subr.bf16.mxu1 %v5391_v0 }
0x1a65   :  { %v2634_v28 = vpop.f32.mrb[16].mxu1 }
0x1a66   :  { %v2635_v29 = vadd.f32 %v5969_v46, %v2634_v28  ;;  %v4663_v30 = vpop.f32.mrb[17].mxu1 }
0x1a68   :  { %5157 = vtanh.f32 %v2635_v29 }
0x1a6d   :  { %v2771_v31 = vpop.f32.mrb[4].mxu1 }
0x1a6e   :  { %v5017_v34 = vadd.f32 %v5922_v61, %v2771_v31  ;;  %v4674_v35 = vpop.f32.mrb[5].mxu1 }
0x1a70   :  { %5159 = vtanh.f32 %v5017_v34  ;;  %v4187_v54 = vmul.f32 -1.442695, %v5017_v34 }
0x1a72   :  { %v5158_v36 = vpop.eup %5157  ;;  %5161 = vpow2.f32 %v4187_v54 }
0x1a73   :  { %v2640_v50 = vcombine.high %v5158_v36, %v5158_v36  ;;  %v2647_v38 = vrot.slane %v5158_v36, %v5973_v7 }
0x1a75   :  { %v2654_v39 = vrot.slane %v2640_v50, %v5973_v7  ;;  %v2655_v52 = vcombine.high %v2647_v38, %v2647_v38  ;;  %v2663_v41 = vrot.slane %v2647_v38, %v5973_v7 }
0x1a77   :  { %v2656_v42 = vcombine.high %v2654_v39, %v2654_v39  ;;  %v2670_v43 = vrot.slane %v2654_v39, %v5973_v7  ;;  %v2677_v44 = vrot.slane %v2655_v52, %v5973_v7  ;;  %v2685_v45 = vcombine.high %v2663_v41, %v2663_v41  ;;  %2697 = vst.msk [vmem:[#allocation13 + $0x1] sm:$0x1] %vm2459_vm10, %v2663_v41 }
0x1a79   :  { %v2684_v47 = vrot.slane %v2656_v42, %v5973_v7  ;;  %v2686_v48 = vcombine.high %v2670_v43, %v2670_v43  ;;  %v2687_v49 = vcombine.high %v2677_v44, %v2677_v44  ;;  %2698 = vst.msk [vmem:[#allocation13 + $0x9] sm:$0x1] %vm2459_vm10, %v2677_v44  ;;  %2699 = vst.msk [vmem:[#allocation13 + $0x11] sm:$0x1] %vm2459_vm10, %v2685_v45 }
0x1a7a   :  { %2701 = vst.msk [vmem:[#allocation13 + $0x21] sm:$0x1] %vm2459_vm10, %v2670_v43  ;;  %v5160_v51 = vpop.eup %5159 }
0x1a7b   :  { %v2688_v53 = vcombine.high %v2684_v47, %v2684_v47  ;;  %2700 = vst.msk [vmem:[#allocation13 + $0x19] sm:$0x1] %vm2459_vm10, %v2687_v49  ;;  %2702 = vst.msk [vmem:[#allocation13 + $0x29] sm:$0x1] %vm2459_vm10, %v2684_v47  ;;  %2785 = vrot.lane.b32.xlu0 %v5160_v51, %s5394_s18 }
0x1a7c   :  { %2703 = vst.msk [vmem:[#allocation13 + $0x31] sm:$0x1] %vm2459_vm10, %v2686_v48  ;;  %v5162_v55 = vpop.eup %5161 }
0x1a7d   :  { %2704 = vst.msk [vmem:[#allocation13 + $0x39] sm:$0x1] %vm2459_vm10, %v2688_v53  ;;  %v2779_v56 = vadd.f32 1.0, %v5162_v55 }
0x1a7f   :  { %5163 = vrcp.f32 %v2779_v56 }
0x1a89   :  { %v5164_v57 = vpop.eup %5163 }
0x1a8a   :  { %v2783_v58 = vmul.f32 %v5164_v57, %v2556_v22 }
0x1aed   :  { %v2786_v4 = vpop.permute.xlu0 %2785 }
0x1aee   :  { %v2788_v6 = vmul.f32 %v5164_v57, %v2786_v4 }
0x1af0   :  { %2790 = vrot.lane.b32.xlu1 %v2788_v6, %s5395_s19 }
0x1b62   :  { %v2791_v8 = vpop.permute.xlu1 %2790 }
0x1b63   :  { %v2793_v9 = vadd.f32 %v2791_v8, %v2783_v58 }
0x1b65   :  { %5165 = vtanh.f32 %v2793_v9 }
0x1b6f   :  { %v5166_v10 = vpop.eup %5165 }
0x1b70   :  { %2796 = vrot.lane.b32.xlu0 %v5166_v10, %s5394_s18 }
0x1be2   :  { %v2797_v11 = vpop.permute.xlu0 %2796 }
0x1be3   :  { %v2799_v15 = vmul.f32 %v5164_v57, %v2797_v11 }
0x1be5   :  { %2801 = vrot.lane.b32.xlu1 %v2799_v15, %s5395_s19 }
0x1c57   :  { %v2802_v32 = vpop.permute.xlu1 %2801 }
0x1c58   :  { %4684 = vmatmul.mubr.msk.f32.vlgmr.msra.gmra.mrb[18].mxu0 %vm252_vm9, %v2802_v32 }
0x1c59   :  { %4954 = vmatpush3.bf16.msra.mxu0 %v5903_v5  ;;  %4694 = vmatprep.mubr.msk.f32.mxu0 %vm5392_vm0, %v5393_v1 }
0x1c5a   :  { %4955 = vmatprep.subr.bf16.mxu0 %v5391_v0 }
0x1c5d   :  { %4957 = vmatpush3.bf16.msra.mxu0 %v5908_v27 }
0x1c5e   :  { %4970 = vmatprep.subr.bf16.mxu0 %v5391_v0 }
0x1c60   :  { %4695 = vmatmul.mubr.msk.f32.vlgmr.msra.gmra.mrb[6].mxu0 %vm252_vm9, %v2802_v32 }
0x1c61   :  { %4972 = vmatpush3.bf16.msra.mxu0 %v5935_v37  ;;  %4727 = vmatprep.mubr.msk.f32.mxu0 %vm5392_vm0, %v5393_v1 }
0x1c62   :  { %4973 = vmatprep.subr.bf16.mxu0 %v5391_v0 }
0x1c65   :  { %4975 = vmatpush3.bf16.msra.mxu0 %v5939_v40 }
0x1c66   :  { %4976 = vmatprep.subr.bf16.mxu0 %v5391_v0 }
0x1d2b   :  { %v2871_v59 = vpop.f32.mrb[18].mxu0 }
0x1d2c   :  { %v2872_v60 = vadd.f32 %v5969_v46, %v2871_v59  ;;  %v4685_v62 = vpop.f32.mrb[19].mxu0 }
0x1d2e   :  { %5167 = vtanh.f32 %v2872_v60 }
0x1d33   :  { %v3008_v63 = vpop.f32.mrb[6].mxu0 }
0x1d34   :  { %v5019_v2 = vadd.f32 %v5922_v61, %v3008_v63  ;;  %v4696_v3 = vpop.f32.mrb[7].mxu0 }
0x1d36   :  { %5169 = vtanh.f32 %v5019_v2  ;;  %v4190_v28 = vmul.f32 -1.442695, %v5019_v2 }
0x1d38   :  { %v5168_v12 = vpop.eup %5167  ;;  %5171 = vpow2.f32 %v4190_v28 }
0x1d39   :  { %v2877_v13 = vcombine.high %v5168_v12, %v5168_v12  ;;  %v2884_v33 = vrot.slane %v5168_v12, %v5973_v7 }
0x1d3b   :  { %v2891_v14 = vrot.slane %v2877_v13, %v5973_v7  ;;  %v2892_v16 = vcombine.high %v2884_v33, %v2884_v33  ;;  %v2900_v17 = vrot.slane %v2884_v33, %v5973_v7 }
0x1d3d   :  { %v2893_v18 = vcombine.high %v2891_v14, %v2891_v14  ;;  %v2907_v19 = vrot.slane %v2891_v14, %v5973_v7  ;;  %v2914_v20 = vrot.slane %v2892_v16, %v5973_v7  ;;  %v2922_v21 = vcombine.high %v2900_v17, %v2900_v17  ;;  %2934 = vst.msk [vmem:[#allocation13 + $0x2] sm:$0x1] %vm2459_vm10, %v2900_v17 }
0x1d3f   :  { %v2921_v22 = vrot.slane %v2893_v18, %v5973_v7  ;;  %v2923_v23 = vcombine.high %v2907_v19, %v2907_v19  ;;  %v2924_v24 = vcombine.high %v2914_v20, %v2914_v20  ;;  %2935 = vst.msk [vmem:[#allocation13 + $0xa] sm:$0x1] %vm2459_vm10, %v2914_v20  ;;  %2936 = vst.msk [vmem:[#allocation13 + $0x12] sm:$0x1] %vm2459_vm10, %v2922_v21 }
0x1d40   :  { %2938 = vst.msk [vmem:[#allocation13 + $0x22] sm:$0x1] %vm2459_vm10, %v2907_v19  ;;  %v5170_v25 = vpop.eup %5169 }
0x1d41   :  { %v2925_v26 = vcombine.high %v2921_v22, %v2921_v22  ;;  %2937 = vst.msk [vmem:[#allocation13 + $0x1a] sm:$0x1] %vm2459_vm10, %v2924_v24  ;;  %2939 = vst.msk [vmem:[#allocation13 + $0x2a] sm:$0x1] %vm2459_vm10, %v2921_v22  ;;  %3022 = vrot.lane.b32.xlu0 %v5170_v25, %s5394_s18 }
0x1d42   :  { %2940 = vst.msk [vmem:[#allocation13 + $0x32] sm:$0x1] %vm2459_vm10, %v2923_v23  ;;  %v5172_v29 = vpop.eup %5171 }
0x1d43   :  { %2941 = vst.msk [vmem:[#allocation13 + $0x3a] sm:$0x1] %vm2459_vm10, %v2925_v26  ;;  %v3016_v30 = vadd.f32 1.0, %v5172_v29 }
0x1d45   :  { %5173 = vrcp.f32 %v3016_v30 }
0x1d4f   :  { %v5174_v31 = vpop.eup %5173 }
0x1d50   :  { %v3020_v36 = vmul.f32 %v5174_v31, %v2793_v9 }
0x1db3   :  { %v3023_v34 = vpop.permute.xlu0 %3022 }
0x1db4   :  { %v3025_v35 = vmul.f32 %v5174_v31, %v3023_v34 }
0x1db6   :  { %3027 = vrot.lane.b32.xlu1 %v3025_v35, %s5395_s19 }
0x1e28   :  { %v3028_v50 = vpop.permute.xlu1 %3027 }
0x1e29   :  { %v3030_v38 = vadd.f32 %v3028_v50, %v3020_v36 }
0x1e2b   :  { %5175 = vtanh.f32 %v3030_v38 }
0x1e35   :  { %v5176_v39 = vpop.eup %5175 }
0x1e36   :  { %3033 = vrot.lane.b32.xlu0 %v5176_v39, %s5394_s18 }
0x1ea8   :  { %v3034_v52 = vpop.permute.xlu0 %3033 }
0x1ea9   :  { %v3036_v41 = vmul.f32 %v5174_v31, %v3034_v52 }
0x1eab   :  { %3038 = vrot.lane.b32.xlu1 %v3036_v41, %s5395_s19 }
0x1f1d   :  { %v3039_v42 = vpop.permute.xlu1 %3038 }
0x1f1e   :  { %4706 = vmatmul.mubr.msk.f32.vlgmr.msra.gmra.mrb[18].mxu1 %vm252_vm9, %v3039_v42 }
0x1f1f   :  { %4966 = vmatpush3.bf16.msra.mxu1 %v5903_v5  ;;  %4716 = vmatprep.mubr.msk.f32.mxu1 %vm5392_vm0, %v5393_v1 }
0x1f20   :  { %4967 = vmatprep.subr.bf16.mxu1 %v5391_v0 }
0x1f23   :  { %4969 = vmatpush3.bf16.msra.mxu1 %v5908_v27 }
0x1f24   :  { %4982 = vmatprep.subr.bf16.mxu1 %v5391_v0 }
0x1f26   :  { %4717 = vmatmul.mubr.msk.f32.vlgmr.msra.gmra.mrb[8].mxu1 %vm252_vm9, %v3039_v42 }
0x1f27   :  { %4984 = vmatpush3.bf16.msra.mxu1 %v5935_v37  ;;  %4749 = vmatprep.mubr.msk.f32.mxu1 %vm5392_vm0, %v5393_v1 }
0x1f28   :  { %4985 = vmatprep.subr.bf16.mxu1 %v5391_v0 }
0x1f2b   :  { %4987 = vmatpush3.bf16.msra.mxu1 %v5939_v40 }
0x1f2c   :  { %4988 = vmatprep.subr.bf16.mxu1 %v5391_v0 }
0x1ff1   :  { %v3108_v43 = vpop.f32.mrb[18].mxu1 }
0x1ff2   :  { %v3109_v44 = vadd.f32 %v5969_v46, %v3108_v43  ;;  %v4707_v45 = vpop.f32.mrb[19].mxu1 }
0x1ff4   :  { %5177 = vtanh.f32 %v3109_v44 }
0x1ff9   :  { %v3245_v47 = vpop.f32.mrb[8].mxu1 }
0x1ffa   :  { %v5021_v48 = vadd.f32 %v5922_v61, %v3245_v47  ;;  %v4718_v49 = vpop.f32.mrb[9].mxu1 }
0x1ffc   :  { %5179 = vtanh.f32 %v5021_v48  ;;  %v4193_v59 = vmul.f32 -1.442695, %v5021_v48 }
0x1ffe   :  { %v5178_v51 = vpop.eup %5177  ;;  %5181 = vpow2.f32 %v4193_v59 }
0x1fff   :  { %v3114_v53 = vcombine.high %v5178_v51, %v5178_v51  ;;  %v3121_v54 = vrot.slane %v5178_v51, %v5973_v7 }
0x2001   :  { %v3128_v55 = vrot.slane %v3114_v53, %v5973_v7  ;;  %v3129_v56 = vcombine.high %v3121_v54, %v3121_v54  ;;  %v3137_v57 = vrot.slane %v3121_v54, %v5973_v7 }
0x2003   :  { %v3130_v4 = vcombine.high %v3128_v55, %v3128_v55  ;;  %v3144_v6 = vrot.slane %v3128_v55, %v5973_v7  ;;  %v3151_v58 = vrot.slane %v3129_v56, %v5973_v7  ;;  %v3159_v8 = vcombine.high %v3137_v57, %v3137_v57  ;;  %3171 = vst.msk [vmem:[#allocation13 + $0x3] sm:$0x1] %vm2459_vm10, %v3137_v57 }
0x2005   :  { %v3158_v9 = vrot.slane %v3130_v4, %v5973_v7  ;;  %v3160_v10 = vcombine.high %v3144_v6, %v3144_v6  ;;  %v3161_v11 = vcombine.high %v3151_v58, %v3151_v58  ;;  %3172 = vst.msk [vmem:[#allocation13 + $0xb] sm:$0x1] %vm2459_vm10, %v3151_v58  ;;  %3173 = vst.msk [vmem:[#allocation13 + $0x13] sm:$0x1] %vm2459_vm10, %v3159_v8 }
0x2006   :  { %3175 = vst.msk [vmem:[#allocation13 + $0x23] sm:$0x1] %vm2459_vm10, %v3144_v6  ;;  %v5180_v15 = vpop.eup %5179 }
0x2007   :  { %v3162_v32 = vcombine.high %v3158_v9, %v3158_v9  ;;  %3174 = vst.msk [vmem:[#allocation13 + $0x1b] sm:$0x1] %vm2459_vm10, %v3161_v11  ;;  %3176 = vst.msk [vmem:[#allocation13 + $0x2b] sm:$0x1] %vm2459_vm10, %v3158_v9  ;;  %3259 = vrot.lane.b32.xlu0 %v5180_v15, %s5394_s18 }
0x2008   :  { %3177 = vst.msk [vmem:[#allocation13 + $0x33] sm:$0x1] %vm2459_vm10, %v3160_v10  ;;  %v5182_v60 = vpop.eup %5181 }
0x2009   :  { %3178 = vst.msk [vmem:[#allocation13 + $0x3b] sm:$0x1] %vm2459_vm10, %v3162_v32  ;;  %v3253_v62 = vadd.f32 1.0, %v5182_v60 }
0x200b   :  { %5183 = vrcp.f32 %v3253_v62 }
0x2015   :  { %v5184_v63 = vpop.eup %5183 }
0x2016   :  { %v3257_v12 = vmul.f32 %v5184_v63, %v3030_v38 }
0x2079   :  { %v3260_v2 = vpop.permute.xlu0 %3259 }
0x207a   :  { %v3262_v3 = vmul.f32 %v5184_v63, %v3260_v2 }
0x207c   :  { %3264 = vrot.lane.b32.xlu1 %v3262_v3, %s5395_s19 }
0x20ee   :  { %v3265_v13 = vpop.permute.xlu1 %3264 }
0x20ef   :  { %v3267_v33 = vadd.f32 %v3265_v13, %v3257_v12 }
0x20f1   :  { %5185 = vtanh.f32 %v3267_v33 }
0x20fb   :  { %v5186_v14 = vpop.eup %5185 }
0x20fc   :  { %3270 = vrot.lane.b32.xlu0 %v5186_v14, %s5394_s18 }
0x216e   :  { %v3271_v16 = vpop.permute.xlu0 %3270 }
0x216f   :  { %v3273_v17 = vmul.f32 %v5184_v63, %v3271_v16 }
0x2171   :  { %3275 = vrot.lane.b32.xlu1 %v3273_v17, %s5395_s19 }
0x21e3   :  { %v3276_v18 = vpop.permute.xlu1 %3275 }
0x21e4   :  { %4728 = vmatmul.mubr.msk.f32.vlgmr.msra.gmra.mrb[20].mxu0 %vm252_vm9, %v3276_v18 }
0x21e5   :  { %4978 = vmatpush3.bf16.msra.mxu0 %v5903_v5  ;;  %4738 = vmatprep.mubr.msk.f32.mxu0 %vm5392_vm0, %v5393_v1 }
0x21e6   :  { %4979 = vmatprep.subr.bf16.mxu0 %v5391_v0 }
0x21e9   :  { %4981 = vmatpush3.bf16.msra.mxu0 %v5908_v27 }
0x21ea   :  { %4994 = vmatprep.subr.bf16.mxu0 %v5391_v0 }
0x21ec   :  { %4739 = vmatmul.mubr.msk.f32.vlgmr.msra.gmra.mrb[10].mxu0 %vm252_vm9, %v3276_v18 }
0x21ed   :  { %4996 = vmatpush3.bf16.msra.mxu0 %v5935_v37  ;;  %4771 = vmatprep.mubr.msk.f32.mxu0 %vm5392_vm0, %v5393_v1 }
0x21ee   :  { %4997 = vmatprep.subr.bf16.mxu0 %v5391_v0 }
0x21f1   :  { %4999 = vmatpush3.bf16.msra.mxu0 %v5939_v40 }
0x21f2   :  { %5000 = vmatprep.subr.bf16.mxu0 %v5391_v0 }
0x22b7   :  { %v3345_v19 = vpop.f32.mrb[20].mxu0 }
0x22b8   :  { %v3346_v20 = vadd.f32 %v5969_v46, %v3345_v19  ;;  %v4729_v21 = vpop.f32.mrb[21].mxu0 }
0x22ba   :  { %5187 = vtanh.f32 %v3346_v20 }
0x22bf   :  { %v3482_v22 = vpop.f32.mrb[10].mxu0 }
0x22c0   :  { %v5023_v23 = vadd.f32 %v5922_v61, %v3482_v22  ;;  %v4740_v24 = vpop.f32.mrb[11].mxu0 }
0x22c2   :  { %5189 = vtanh.f32 %v5023_v23  ;;  %v4196_v43 = vmul.f32 -1.442695, %v5023_v23 }
0x22c4   :  { %v5188_v25 = vpop.eup %5187  ;;  %5191 = vpow2.f32 %v4196_v43 }
0x22c5   :  { %v3351_v26 = vcombine.high %v5188_v25, %v5188_v25  ;;  %v3358_v28 = vrot.slane %v5188_v25, %v5973_v7 }
0x22c7   :  { %v3365_v29 = vrot.slane %v3351_v26, %v5973_v7  ;;  %v3366_v30 = vcombine.high %v3358_v28, %v3358_v28  ;;  %v3374_v31 = vrot.slane %v3358_v28, %v5973_v7 }
0x22c9   :  { %v3367_v34 = vcombine.high %v3365_v29, %v3365_v29  ;;  %v3381_v35 = vrot.slane %v3365_v29, %v5973_v7  ;;  %v3388_v36 = vrot.slane %v3366_v30, %v5973_v7  ;;  %v3396_v50 = vcombine.high %v3374_v31, %v3374_v31  ;;  %3408 = vst.msk [vmem:[#allocation13 + $0x4] sm:$0x1] %vm2459_vm10, %v3374_v31 }
0x22cb   :  { %v3395_v38 = vrot.slane %v3367_v34, %v5973_v7  ;;  %v3397_v39 = vcombine.high %v3381_v35, %v3381_v35  ;;  %v3398_v52 = vcombine.high %v3388_v36, %v3388_v36  ;;  %3409 = vst.msk [vmem:[#allocation13 + $0xc] sm:$0x1] %vm2459_vm10, %v3388_v36  ;;  %3410 = vst.msk [vmem:[#allocation13 + $0x14] sm:$0x1] %vm2459_vm10, %v3396_v50 }
0x22cc   :  { %3412 = vst.msk [vmem:[#allocation13 + $0x24] sm:$0x1] %vm2459_vm10, %v3381_v35  ;;  %v5190_v41 = vpop.eup %5189 }
0x22cd   :  { %v3399_v42 = vcombine.high %v3395_v38, %v3395_v38  ;;  %3411 = vst.msk [vmem:[#allocation13 + $0x1c] sm:$0x1] %vm2459_vm10, %v3398_v52  ;;  %3413 = vst.msk [vmem:[#allocation13 + $0x2c] sm:$0x1] %vm2459_vm10, %v3395_v38  ;;  %3496 = vrot.lane.b32.xlu0 %v5190_v41, %s5394_s18 }
0x22ce   :  { %3414 = vst.msk [vmem:[#allocation13 + $0x34] sm:$0x1] %vm2459_vm10, %v3397_v39  ;;  %v5192_v44 = vpop.eup %5191 }
0x22cf   :  { %3415 = vst.msk [vmem:[#allocation13 + $0x3c] sm:$0x1] %vm2459_vm10, %v3399_v42  ;;  %v3490_v45 = vadd.f32 1.0, %v5192_v44 }
0x22d1   :  { %5193 = vrcp.f32 %v3490_v45 }
0x22db   :  { %v5194_v47 = vpop.eup %5193 }
0x22dc   :  { %v3494_v51 = vmul.f32 %v5194_v47, %v3267_v33 }
0x233f   :  { %v3497_v48 = vpop.permute.xlu0 %3496 }
0x2340   :  { %v3499_v49 = vmul.f32 %v5194_v47, %v3497_v48 }
0x2342   :  { %3501 = vrot.lane.b32.xlu1 %v3499_v49, %s5395_s19 }
0x23b4   :  { %v3502_v53 = vpop.permute.xlu1 %3501 }
0x23b5   :  { %v3504_v54 = vadd.f32 %v3502_v53, %v3494_v51 }
0x23b7   :  { %5195 = vtanh.f32 %v3504_v54 }
0x23c1   :  { %v5196_v55 = vpop.eup %5195 }
0x23c2   :  { %3507 = vrot.lane.b32.xlu0 %v5196_v55, %s5394_s18 }
0x2434   :  { %v3508_v56 = vpop.permute.xlu0 %3507 }
0x2435   :  { %v3510_v57 = vmul.f32 %v5194_v47, %v3508_v56 }
0x2437   :  { %3512 = vrot.lane.b32.xlu1 %v3510_v57, %s5395_s19 }
0x24a9   :  { %v3513_v4 = vpop.permute.xlu1 %3512 }
0x24aa   :  { %4750 = vmatmul.mubr.msk.f32.vlgmr.msra.gmra.mrb[20].mxu1 %vm252_vm9, %v3513_v4 }
0x24ab   :  { %4990 = vmatpush3.bf16.msra.mxu1 %v5903_v5  ;;  %4760 = vmatprep.mubr.msk.f32.mxu1 %vm5392_vm0, %v5393_v1 }
0x24ac   :  { %4991 = vmatprep.subr.bf16.mxu1 %v5391_v0 }
0x24af   :  { %4993 = vmatpush3.bf16.msra.mxu1 %v5908_v27 }
0x24b0   :  { %5006 = vmatprep.subr.bf16.mxu1 %v5391_v0 }
0x24b2   :  { %4761 = vmatmul.mubr.msk.f32.vlgmr.msra.gmra.mrb[12].mxu1 %vm252_vm9, %v3513_v4 }
0x24b3   :  { %5008 = vmatpush3.bf16.msra.mxu1 %v5935_v37  ;;  %4793 = vmatprep.mubr.msk.f32.mxu1 %vm5392_vm0, %v5393_v1 }
0x24b4   :  { %5009 = vmatprep.subr.bf16.mxu1 %v5391_v0 }
0x24b7   :  { %5011 = vmatpush3.bf16.msra.mxu1 %v5939_v40 }
0x257d   :  { %v3582_v6 = vpop.f32.mrb[20].mxu1 }
0x257e   :  { %v3583_v58 = vadd.f32 %v5969_v46, %v3582_v6  ;;  %v4751_v8 = vpop.f32.mrb[21].mxu1 }
0x2580   :  { %5197 = vtanh.f32 %v3583_v58 }
0x2585   :  { %v3719_v9 = vpop.f32.mrb[12].mxu1 }
0x2586   :  { %v5025_v10 = vadd.f32 %v5922_v61, %v3719_v9  ;;  %v4762_v11 = vpop.f32.mrb[13].mxu1 }
0x2588   :  { %5199 = vtanh.f32 %v5025_v10  ;;  %v4199_v17 = vmul.f32 -1.442695, %v5025_v10 }
0x258a   :  { %v5198_v15 = vpop.eup %5197  ;;  %5201 = vpow2.f32 %v4199_v17 }
0x258b   :  { %v3588_v32 = vcombine.high %v5198_v15, %v5198_v15  ;;  %v3595_v37 = vrot.slane %v5198_v15, %v5973_v7 }
0x258d   :  { %v3602_v59 = vrot.slane %v3588_v32, %v5973_v7  ;;  %v3603_v60 = vcombine.high %v3595_v37, %v3595_v37  ;;  %v3611_v62 = vrot.slane %v3595_v37, %v5973_v7 }
0x258f   :  { %v3604_v40 = vcombine.high %v3602_v59, %v3602_v59  ;;  %v3618_v63 = vrot.slane %v3602_v59, %v5973_v7  ;;  %v3625_v2 = vrot.slane %v3603_v60, %v5973_v7  ;;  %v3633_v3 = vcombine.high %v3611_v62, %v3611_v62  ;;  %3645 = vst.msk [vmem:[#allocation13 + $0x5] sm:$0x1] %vm2459_vm10, %v3611_v62 }
0x2591   :  { %v3632_v12 = vrot.slane %v3604_v40, %v5973_v7  ;;  %v3634_v13 = vcombine.high %v3618_v63, %v3618_v63  ;;  %v3635_v33 = vcombine.high %v3625_v2, %v3625_v2  ;;  %3646 = vst.msk [vmem:[#allocation13 + $0xd] sm:$0x1] %vm2459_vm10, %v3625_v2  ;;  %3647 = vst.msk [vmem:[#allocation13 + $0x15] sm:$0x1] %vm2459_vm10, %v3633_v3 }
0x2592   :  { %3649 = vst.msk [vmem:[#allocation13 + $0x25] sm:$0x1] %vm2459_vm10, %v3618_v63  ;;  %v5200_v14 = vpop.eup %5199 }
0x2593   :  { %v3636_v16 = vcombine.high %v3632_v12, %v3632_v12  ;;  %3648 = vst.msk [vmem:[#allocation13 + $0x1d] sm:$0x1] %vm2459_vm10, %v3635_v33  ;;  %3650 = vst.msk [vmem:[#allocation13 + $0x2d] sm:$0x1] %vm2459_vm10, %v3632_v12  ;;  %3733 = vrot.lane.b32.xlu0 %v5200_v14, %s5394_s18 }
0x2594   :  { %3651 = vst.msk [vmem:[#allocation13 + $0x35] sm:$0x1] %vm2459_vm10, %v3634_v13  ;;  %v5202_v18 = vpop.eup %5201 }
0x2595   :  { %3652 = vst.msk [vmem:[#allocation13 + $0x3d] sm:$0x1] %vm2459_vm10, %v3636_v16  ;;  %v3727_v19 = vadd.f32 1.0, %v5202_v18 }
0x2597   :  { %5203 = vrcp.f32 %v3727_v19 }
0x25a1   :  { %v5204_v20 = vpop.eup %5203 }
0x25a2   :  { %v3731_v23 = vmul.f32 %v5204_v20, %v3504_v54 }
0x2605   :  { %v3734_v21 = vpop.permute.xlu0 %3733 }
0x2606   :  { %v3736_v22 = vmul.f32 %v5204_v20, %v3734_v21 }
0x2608   :  { %3738 = vrot.lane.b32.xlu1 %v3736_v22, %s5395_s19 }
0x267a   :  { %v3739_v24 = vpop.permute.xlu1 %3738 }
0x267b   :  { %v3741_v25 = vadd.f32 %v3739_v24, %v3731_v23 }
0x267d   :  { %5205 = vtanh.f32 %v3741_v25 }
0x2687   :  { %v5206_v26 = vpop.eup %5205 }
0x2688   :  { %3744 = vrot.lane.b32.xlu0 %v5206_v26, %s5394_s18 }
0x26fa   :  { %v3745_v28 = vpop.permute.xlu0 %3744 }
0x26fb   :  { %v3747_v29 = vmul.f32 %v5204_v20, %v3745_v28 }
0x26fd   :  { %3749 = vrot.lane.b32.xlu1 %v3747_v29, %s5395_s19 }
0x276f   :  { %v3750_v30 = vpop.permute.xlu1 %3749 }
0x2770   :  { %4772 = vmatmul.mubr.msk.f32.vlgmr.msra.gmra.mrb[22].mxu0 %vm252_vm9, %v3750_v30 }
0x2771   :  { %5002 = vmatpush3.bf16.msra.mxu0 %v5903_v5  ;;  %4782 = vmatprep.mubr.msk.f32.mxu0 %vm5392_vm0, %v5393_v1 }
0x2772   :  { %5003 = vmatprep.subr.bf16.mxu0 %v5391_v0 }
0x2775   :  { %5005 = vmatpush3.bf16.msra.mxu0 %v5908_v27 }
0x2778   :  { %4783 = vmatmul.mubr.msk.f32.vlgmr.msra.gmra.mrb[14].mxu0 %vm252_vm9, %v3750_v30 }
0x2843   :  { %v3819_v31 = vpop.f32.mrb[22].mxu0 }
0x2844   :  { %v3820_v34 = vadd.f32 %v5969_v46, %v3819_v31  ;;  %v4773_v35 = vpop.f32.mrb[23].mxu0 }
0x2846   :  { %5207 = vtanh.f32 %v3820_v34 }
0x284b   :  { %v3956_v36 = vpop.f32.mrb[14].mxu0 }
0x284c   :  { %v5027_v50 = vadd.f32 %v5922_v61, %v3956_v36  ;;  %v4784_v38 = vpop.f32.mrb[15].mxu0 }
0x284e   :  { %5209 = vtanh.f32 %v5027_v50  ;;  %v4202_v51 = vmul.f32 -1.442695, %v5027_v50 }
0x2850   :  { %v5208_v5 = vpop.eup %5207  ;;  %5211 = vpow2.f32 %v4202_v51 }
0x2851   :  { %v3825_v39 = vcombine.high %v5208_v5, %v5208_v5  ;;  %v3832_v1 = vrot.slane %v5208_v5, %v5973_v7 }
0x2853   :  { %v3839_v0 = vrot.slane %v3825_v39, %v5973_v7  ;;  %v3840_v52 = vcombine.high %v3832_v1, %v3832_v1  ;;  %v3848_v27 = vrot.slane %v3832_v1, %v5973_v7 }
0x2855   :  { %v3841_v41 = vcombine.high %v3839_v0, %v3839_v0  ;;  %v3855_v42 = vrot.slane %v3839_v0, %v5973_v7  ;;  %v3862_v43 = vrot.slane %v3840_v52, %v5973_v7  ;;  %v3870_v44 = vcombine.high %v3848_v27, %v3848_v27  ;;  %3882 = vst.msk [vmem:[#allocation13 + $0x6] sm:$0x1] %vm2459_vm10, %v3848_v27 }
0x2857   :  { %v3869_v61 = vrot.slane %v3841_v41, %v5973_v7  ;;  %v3871_v45 = vcombine.high %v3855_v42, %v3855_v42  ;;  %v3872_v47 = vcombine.high %v3862_v43, %v3862_v43  ;;  %3883 = vst.msk [vmem:[#allocation13 + $0xe] sm:$0x1] %vm2459_vm10, %v3862_v43  ;;  %3884 = vst.msk [vmem:[#allocation13 + $0x16] sm:$0x1] %vm2459_vm10, %v3870_v44 }
0x2858   :  { %3886 = vst.msk [vmem:[#allocation13 + $0x26] sm:$0x1] %vm2459_vm10, %v3855_v42  ;;  %v5210_v48 = vpop.eup %5209 }
0x2859   :  { %v3873_v49 = vcombine.high %v3869_v61, %v3869_v61  ;;  %3885 = vst.msk [vmem:[#allocation13 + $0x1e] sm:$0x1] %vm2459_vm10, %v3872_v47  ;;  %3887 = vst.msk [vmem:[#allocation13 + $0x2e] sm:$0x1] %vm2459_vm10, %v3869_v61  ;;  %3970 = vrot.lane.b32.xlu0 %v5210_v48, %s5394_s18 }
0x285a   :  { %3888 = vst.msk [vmem:[#allocation13 + $0x36] sm:$0x1] %vm2459_vm10, %v3871_v45  ;;  %v5212_v53 = vpop.eup %5211 }
0x285b   :  { %3889 = vst.msk [vmem:[#allocation13 + $0x3e] sm:$0x1] %vm2459_vm10, %v3873_v49  ;;  %v3964_v54 = vadd.f32 1.0, %v5212_v53 }
0x285d   :  { %5213 = vrcp.f32 %v3964_v54 }
0x2867   :  { %v5214_v55 = vpop.eup %5213 }
0x2868   :  { %v3968_v4 = vmul.f32 %v5214_v55, %v3741_v25 }
0x28cb   :  { %v3971_v56 = vpop.permute.xlu0 %3970 }
0x28cc   :  { %v3973_v57 = vmul.f32 %v5214_v55, %v3971_v56 }
0x28ce   :  { %3975 = vrot.lane.b32.xlu1 %v3973_v57, %s5395_s19 }
0x2940   :  { %v3976_v6 = vpop.permute.xlu1 %3975 }
0x2941   :  { %v3978_v58 = vadd.f32 %v3976_v6, %v3968_v4 }
0x2943   :  { %5215 = vtanh.f32 %v3978_v58 }
0x294d   :  { %v5216_v8 = vpop.eup %5215 }
0x294e   :  { %3981 = vrot.lane.b32.xlu0 %v5216_v8, %s5394_s18 }
0x29c0   :  { %v3982_v9 = vpop.permute.xlu0 %3981 }
0x29c1   :  { %v3984_v10 = vmul.f32 %v5214_v55, %v3982_v9 }
0x29c3   :  { %3986 = vrot.lane.b32.xlu1 %v3984_v10, %s5395_s19 }
0x2a35   :  { %v3987_v11 = vpop.permute.xlu1 %3986 }
0x2a36   :  { %4794 = vmatmul.mubr.msk.f32.vlgmr.msra.gmra.mrb[22].mxu1 %vm252_vm9, %v3987_v11 }
0x2b09   :  { %v4056_v15 = vpop.f32.mrb[22].mxu1 }
0x2b0a   :  { %v4057_v32 = vadd.f32 %v5969_v46, %v4056_v15  ;;  %v4795_v37 = vpop.f32.mrb[23].mxu1 }
0x2b0c   :  { %5217 = vtanh.f32 %v4057_v32 }
0x2b16   :  { %v5218_v59 = vpop.eup %5217 }
0x2b17   :  { %v4062_v60 = vcombine.high %v5218_v59, %v5218_v59  ;;  %v4069_v62 = vrot.slane %v5218_v59, %v5973_v7 }
0x2b19   :  { %v4076_v40 = vrot.slane %v4062_v60, %v5973_v7  ;;  %v4077_v63 = vcombine.high %v4069_v62, %v4069_v62  ;;  %v4085_v2 = vrot.slane %v4069_v62, %v5973_v7 }
0x2b1b   :  { %v4078_v3 = vcombine.high %v4076_v40, %v4076_v40  ;;  %v4092_v12 = vrot.slane %v4076_v40, %v5973_v7  ;;  %v4099_v13 = vrot.slane %v4077_v63, %v5973_v7  ;;  %v4107_v33 = vcombine.high %v4085_v2, %v4085_v2  ;;  %4119 = vst.msk [vmem:[#allocation13 + $0x7] sm:$0x1] %vm2459_vm10, %v4085_v2 }
0x2b1d   :  { %v4106_v46 = vrot.slane %v4078_v3, %v5973_v7  ;;  %v4108_v14 = vcombine.high %v4092_v12, %v4092_v12  ;;  %v4109_v16 = vcombine.high %v4099_v13, %v4099_v13  ;;  %4120 = vst.msk [vmem:[#allocation13 + $0xf] sm:$0x1] %vm2459_vm10, %v4099_v13  ;;  %4121 = vst.msk [vmem:[#allocation13 + $0x17] sm:$0x1] %vm2459_vm10, %v4107_v33 }
0x2b1e   :  { %4123 = vst.msk [vmem:[#allocation13 + $0x27] sm:$0x1] %vm2459_vm10, %v4092_v12 }
0x2b1f   :  { %v4110_v17 = vcombine.high %v4106_v46, %v4106_v46  ;;  %4122 = vst.msk [vmem:[#allocation13 + $0x1f] sm:$0x1] %vm2459_vm10, %v4109_v16  ;;  %4124 = vst.msk [vmem:[#allocation13 + $0x2f] sm:$0x1] %vm2459_vm10, %v4106_v46 }
0x2b20   :  { %4125 = vst.msk [vmem:[#allocation13 + $0x37] sm:$0x1] %vm2459_vm10, %v4108_v14 }
0x2b21   :  { %4126 = vst.msk [vmem:[#allocation13 + $0x3f] sm:$0x1] %vm2459_vm10, %v4110_v17 }
0x2b22   :  { %5362 = shalt.err (!%p5359_p10)
}
0x2b23   :  { %s5363_s12 = scalar_lea.hbm %s6230_s9, 1024 }
0x2b24   :  { %p5364_p11 = scmp.ne.s32.totalorder %s6230_s9, %s5363_s12  ;;  %p5367_p12 = scmp.lt.u32.totalorder %s5363_s12, %s6230_s9 }
0x2b26   :  { %p5369_p13 = pnand %p5367_p12, %p5364_p11 }
0x2b28   :  { %5372 = shalt.err (!%p5369_p13)
}
0x2b29   :  { %4138 = dma.vmem_to_hbm [thread:$0]  %s4133_s24, 1024, %s6230_s9, [#allocation4], %s5385_s21, %s5385_s21, %s5386_s22  }
0x2b2a   :  { %5381 = dma.done.wait [#allocation4], 1024  }
0x2b2b   :  { %5382 = vsyncadd [#allocation4], 4294966272 }
0x2b2c   :  { %4142 = vsyncpa [#allocation3], 1 }
0x2b2d   :  { %4143 = vsyncpa [#allocation6], 1 }
0x2b2e   :  { %4144 = vsyncpa [#allocation9], 1 }
0x2b2f   :  { %4145 = vsyncpa [#allocation12], 1 }
0x2b30   :  { %4146 = vsyncpa [#allocation4], 1 }

</bundles_post_ra>
